<compile_context>
chip_gen: v6e
topology: v6e:2x2x1
jax: 0.10.0
libtpu: 0.0.40
codegen_flags: <defaults>
</compile_context>

<pallas_src>
import math
import functools

import numpy as np
import jax
import jax.numpy as jnp
from jax import lax
from jax.experimental import pallas as pl
from jax.experimental.pallas import tpu as pltpu


CHUNK = 8  # scan chunk; L is padded to a multiple of CHUNK.
           # Drop to 4 at very large d_inner to cap vreg pressure in the
           # unrolled recurrence (review item #11).


# =============================================================================
# Fused kernel: all ResidualBlocks + norm_f + lm_head/avg-pool + HRV-concat MLP
# grid = (B, n_layer), dimension_semantics = ("parallel", "arbitrary")
# =============================================================================
def _mamba_fused_kernel(x_ref, nw_ref, win_ref, cw_ref, cb_ref, wdt_ref,
                        bdt_ref, wbc_ref, aT_ref, dsk_ref, wout_ref,
                        nfw_ref, ecs_ref, hrv_ref,
                        w1_ref, b1_ref, w2_ref, b2_ref, w3_ref, b3_ref,
                        o_ref,
                        xcar, dt_scr, du_scr, b_scr, c_scr, y_scr,
                        *, d_inner, d_state, d_conv, chunk, l_real, inv_lv):
    t = pl.program_id(1)                       # layer index (sequential axis)
    n_layer = pl.num_programs(1)
    L, d_model = xcar.shape
    n = d_state
    k = d_conv

    # Layer input: fresh embedding at layer 0, else the carried activation.
    @pl.when(t == 0)
    def _():
        xcar[...] = x_ref[...]
    cur = xcar[...]                                            # (L, d_model) f32

    # ---- RMSNorm (f32), eps = 1e-5 -------------------------------------------
    ms = jnp.mean(cur * cur, axis=-1, keepdims=True)
    xn = cur * lax.rsqrt(ms + 1e-5) * nw_ref[0, :]

    # ---- in_proj: bf16 MXU operands, f32 accumulation ------------------------
    xz = jnp.dot(xn.astype(jnp.bfloat16), win_ref[...],
                 preferred_element_type=jnp.float32)           # (L, 2*d_inner)
    xi = xz[:, :d_inner]
    res = xz[:, d_inner:]

    # ---- causal depthwise conv1d: XLU roll + iota mask (no concat relayouts) --
    # PyTorch Conv1d(groups=d_inner, padding=k-1)[..., :L]:
    #   out[t] = bias + sum_s w[k-1-s] * x[t-s]   (zeros for t-s < 0)
    row = lax.broadcasted_iota(jnp.int32, (L, 1), 0)           # hoisted once
    acc = xi * cw_ref[k - 1, :]
    for s in range(1, k):                                      # static unroll
        shifted = jnp.where(row >= s, pltpu.roll(xi, shift=s, axis=0), 0.0)
        acc = acc + shifted * cw_ref[k - 1 - s, :]
    acc = acc + cb_ref[0, :]
    xc = acc * jax.nn.sigmoid(acc)                             # SiLU (f32)

    # ---- dt path (dt_proj folded into x_proj offline), kept in f32 -----------
    # (dt feeds exp(dt*A) in the recurrence, so avoid bf16 rounding here)
    z = jnp.dot(xc, wdt_ref[...],
                preferred_element_type=jnp.float32) + bdt_ref[0, :]
    dt = jnp.maximum(z, 0.0) + jnp.log1p(jnp.exp(-jnp.abs(z)))  # softplus

    # ---- B / C projection: bf16 MXU, f32 accumulation ------------------------
    bc = jnp.dot(xc.astype(jnp.bfloat16), wbc_ref[...],
                 preferred_element_type=jnp.float32)           # (L, 2n)

    # Stage scan inputs (all O(L*d_inner) or smaller) in VMEM scratch.
    dt_scr[...] = dt
    du_scr[...] = dt * xc
    b_scr[...] = bc[:, :n]
    c_scr[...] = bc[:, n:]

    aT = aT_ref[...]                                           # (n, d_inner) = A^T
    n_chunks = L // chunk

    # ---- selective scan: lane-dense state (n sublanes, d_inner lanes) --------
    # exp() / dB*u are computed per chunk (scratch ~ chunk*n*d_inner, not
    # L*n*d_inner); the C contraction is VPU mul + sublane reduce, not MXU.
    def chunk_body(c, state):
        base = pl.multiple_of(c * chunk, chunk)
        dt_c = dt_scr[pl.ds(base, chunk), :]                   # (chunk, d_inner)
        du_c = du_scr[pl.ds(base, chunk), :]
        B_c = b_scr[pl.ds(base, chunk), :]                     # (chunk, n)
        C_c = c_scr[pl.ds(base, chunk), :]
        dA_c = jnp.exp(dt_c[:, None, :] * aT[None, :, :])      # (chunk, n, d_in)
        dBu_c = B_c[:, :, None] * du_c[:, None, :]             # (chunk, n, d_in)
        rows = []
        for j in range(chunk):                                 # static unroll
            state = dA_c[j] * state + dBu_c[j]                 # (n, d_inner) FMA
            # y_j = sum_n C[j,n] * state[n,:]  -- VPU mul + XLU sublane reduce
            rows.append(jnp.sum(state * C_c[j][:, None], axis=0, keepdims=True))
        # sublane-aligned (chunk, d_inner) store
        y_scr[pl.ds(base, chunk), :] = jnp.concatenate(rows, axis=0)
        return state

    state0 = jnp.zeros((n, d_inner), jnp.float32)
    lax.fori_loop(0, n_chunks, chunk_body, state0)
    # Production-scale note: add an L-tile grid axis with this state (and a
    # (d_conv-1, d_inner) conv tail) carried across tiles, plus tb>1 batch
    # blocking to amortize per-layer weight DMA -- not needed at demo sizes.

    # ---- D skip, gate, out_proj, residual add ---------------------------------
    y = y_scr[...] + xc * dsk_ref[0, :]
    y = y * (res * jax.nn.sigmoid(res))                        # y * silu(res)
    out = jnp.dot(y.astype(jnp.bfloat16), wout_ref[...],
                  preferred_element_type=jnp.float32)          # (L, d_model)
    new_x = cur + out
    xcar[...] = new_x                                          # carry to layer t+1

    # ---- fused head epilogue at the last layer --------------------------------
    # norm_f -> lm_head (weight-tied, bias-free) -> AdaptiveAvgPool2d((1,1))
    #   mean_{l,v} (xn @ E^T) == (sum_l xn) . (sum_v E[v]) / (l*vocab)
    # -> concat(HRV) -> Linear(8,64)-ELU-Linear(64,32)-ELU-Linear(32,1)
    @pl.when(t == n_layer - 1)
    def _():
        msf = jnp.mean(new_x * new_x, axis=-1, keepdims=True)
        xnf = new_x * lax.rsqrt(msf + 1e-5) * nfw_ref[0, :]
        scores = jnp.sum(xnf * ecs_ref[0, :], axis=-1, keepdims=True)  # (L, 1)
        scores = jnp.where(row < l_real, scores, 0.0)          # ignore pad rows
        pooled = jnp.sum(scores, axis=0, keepdims=True) * inv_lv       # (1, 1)
        feats = jnp.concatenate([pooled, hrv_ref[...]], axis=1)        # (1, 8)

        def elu(v):
            # exp only evaluated on min(v,0): no discarded infs for large v
            return jnp.where(v > 0, v, jnp.exp(jnp.minimum(v, 0.0)) - 1.0)

        h = elu(jnp.dot(feats, w1_ref[...],
                        preferred_element_type=jnp.float32) + b1_ref[0, :])
        h = elu(jnp.dot(h, w2_ref[...],
                        preferred_element_type=jnp.float32) + b2_ref[0, :])
        o_ref[...] = jnp.dot(h, w3_ref[...],
                             preferred_element_type=jnp.float32) + b3_ref[0, :]


def mamba_fused(x, hrv, prep, l_real):
    """x: (B, L_pad, d_model) f32 embeddings (L_pad % CHUNK == 0); hrv: (B,1,7)."""
    B, L, d_model = x.shape
    n_layer, d_state, d_inner = prep["A_T"].shape
    k = prep["conv_w"].shape[1]
    vocab = prep["embedding"].shape[0]

    kern = functools.partial(_mamba_fused_kernel, d_inner=d_inner,
                             d_state=d_state, d_conv=k, chunk=CHUNK,
                             l_real=l_real, inv_lv=1.0 / float(l_real * vocab))

    def wspec(arr):
        # stacked per-layer weight: block = one layer's weights, indexed by t
        return pl.BlockSpec((None,) + arr.shape[1:], lambda b, t: (t, 0, 0))

    def gspec(arr):
        # global (non-layer) weight: constant block index -> fetched once
        nd = arr.ndim
        return pl.BlockSpec(arr.shape, lambda b, t, _n=nd: (0,) * _n)

    x_spec = pl.BlockSpec((None, L, d_model), lambda b, t: (b, 0, 0))
    hrv_spec = pl.BlockSpec((None, 1, 7), lambda b, t: (b, 0, 0))
    out_spec = pl.BlockSpec((None, 1, 1), lambda b, t: (b, 0, 0))

    grid_spec = pltpu.PrefetchScalarGridSpec(
        num_scalar_prefetch=0,
        grid=(B, n_layer),
        in_specs=[x_spec,
                  wspec(prep["norm_w"]), wspec(prep["w_in"]),
                  wspec(prep["conv_w"]), wspec(prep["conv_b"]),
                  wspec(prep["w_dt_comb"]), wspec(prep["b_dt"]),
                  wspec(prep["w_bc"]),
                  wspec(prep["A_T"]), wspec(prep["D"]),
                  wspec(prep["w_out"]),
                  gspec(prep["norm_f_w"]), gspec(prep["emb_colsum"]),
                  hrv_spec,
                  gspec(prep["net_w1"]), gspec(prep["net_b1"]),
                  gspec(prep["net_w2"]), gspec(prep["net_b2"]),
                  gspec(prep["net_w3"]), gspec(prep["net_b3"])],
        out_specs=out_spec,
        scratch_shapes=[
            pltpu.VMEM((L, d_model), jnp.float32),   # layer->layer carry
            pltpu.VMEM((L, d_inner), jnp.float32),   # dt
            pltpu.VMEM((L, d_inner), jnp.float32),   # dt * u
            pltpu.VMEM((L, d_state), jnp.float32),   # B
            pltpu.VMEM((L, d_state), jnp.float32),   # C
            pltpu.VMEM((L, d_inner), jnp.float32),   # y
        ],
    )
    out = pl.pallas_call(
        kern,
        out_shape=jax.ShapeDtypeStruct((B, 1, 1), jnp.float32),
        grid_spec=grid_spec,
        compiler_params=pltpu.CompilerParams(
            dimension_semantics=("parallel", "arbitrary"),
            # 32 MiB is safe on v5e/v6e/v7x; can be raised to ~48 MiB on v7x
            # (and higher on v5e/v6e) once L-tiles are enlarged.
            vmem_limit_bytes=32 * 1024 * 1024),
    )(x, prep["norm_w"], prep["w_in"], prep["conv_w"], prep["conv_b"],
      prep["w_dt_comb"], prep["b_dt"], prep["w_bc"], prep["A_T"], prep["D"],
      prep["w_out"], prep["norm_f_w"], prep["emb_colsum"], hrv,
      prep["net_w1"], prep["net_b1"], prep["net_w2"], prep["net_b2"],
      prep["net_w3"], prep["net_b3"])
    return out[:, 0, :]                                        # (B, 1)


# =============================================================================
# Host-side HRV feature extraction (data-dependent numpy, stays on host)
# =============================================================================
def calculate_hrv_metrics(ppg_signals, sampling_rate=30):
    out = []
    for sig in np.asarray(ppg_signals, dtype=np.float32):
        diff = np.diff(sig)
        peaks = [i for i in range(1, len(diff) - 1)
                 if diff[i - 1] > 0 and diff[i + 1] < 0 and sig[i] > 0]
        rr = np.diff(np.array(peaks, dtype=np.float32)) / float(sampling_rate)
        if len(rr) < 2:
            vals = np.zeros(7, np.float32)
        else:
            sdnn = np.std(rr)
            rmssd = np.sqrt(np.mean(np.diff(rr) ** 2))
            nn50 = float(np.sum(np.abs(np.diff(rr)) > 0.05))
            pnn50 = nn50 / len(rr) * 100.0
            # TODO(synk): Lomb-Scargle LF/HF power needs astropy; zeros used instead.
            vals = np.array([nn50, sdnn, rmssd, pnn50, 0.0, 0.0, 0.0], np.float32)
        out.append(vals)
    return np.stack(out).astype(np.float32)


# =============================================================================
# Full model forward
# =============================================================================
def mamba_forward(ppg_signal, prep):
    ppg_np = np.asarray(ppg_signal, dtype=np.float32)
    hrv = jnp.asarray(calculate_hrv_metrics(ppg_np))[:, None, :]   # (B, 1, 7)
    vocab = prep["embedding"].shape[0]
    ids = jnp.clip(jnp.asarray(ppg_np).astype(jnp.int32), 0, vocab - 1)
    x = prep["embedding"][ids]                                 # (B, L, d_model)
    B, L, _ = x.shape
    l_pad = ((L + CHUNK - 1) // CHUNK) * CHUNK                 # causal ops keep
    if l_pad != L:                                             # real rows exact
        x = jnp.pad(x, ((0, 0), (0, l_pad - L), (0, 0)))
    return mamba_fused(x, hrv, prep, l_real=L)                 # (B, 1)


# =============================================================================
# Parameters: raw init + one-time offline preparation (stacking, dt_proj fold
# kept f32, A = -exp(A_log) transpose, embedding column sum, bf16 MXU weights)
# =============================================================================
def init_params(key, d_model, n_layer, vocab_size, d_state, expand, d_conv):
    d_inner = int(expand * d_model)
    dt_rank = math.ceil(d_model / 16)
    keys = jax.random.split(key, 8 + n_layer)

    def rnd(kk, shape, scale):
        return jax.random.normal(kk, shape, jnp.float32) * scale

    params = {"embedding": rnd(keys[0], (vocab_size, d_model), 0.02)}
    layers = []
    for li in range(n_layer):
        lk = jax.random.split(keys[1 + li], 8)
        A = jnp.tile(jnp.arange(1, d_state + 1, dtype=jnp.float32)[None, :],
                     (d_inner, 1))
        layers.append(dict(
            norm_w=jnp.ones((1, d_model), jnp.float32),
            w_in=rnd(lk[0], (d_model, 2 * d_inner), 0.05),
            conv_w=rnd(lk[1], (d_conv, d_inner), 0.2),
            conv_b=rnd(lk[2], (1, d_inner), 0.05),
            w_x=rnd(lk[3], (d_inner, dt_rank + 2 * d_state), 0.05),
            w_dt=rnd(lk[4], (dt_rank, d_inner), 0.2),
            b_dt=rnd(lk[5], (1, d_inner), 0.05),
            A_log=jnp.log(A),
            D=jnp.ones((1, d_inner), jnp.float32),
            w_out=rnd(lk[6], (d_inner, d_model), 0.05),
        ))
    params["layers"] = layers
    params["norm_f_w"] = jnp.ones((1, d_model), jnp.float32)
    params["net_w1"] = rnd(keys[-5], (8, 64), 0.2)
    params["net_b1"] = jnp.zeros((1, 64), jnp.float32)
    params["net_w2"] = rnd(keys[-4], (64, 32), 0.2)
    params["net_b2"] = jnp.zeros((1, 32), jnp.float32)
    params["net_w3"] = rnd(keys[-3], (32, 1), 0.2)
    params["net_b3"] = jnp.zeros((1, 1), jnp.float32)
    return params


def prepare_params(raw):
    layers = raw["layers"]

    def stack(name):
        return jnp.stack([lp[name] for lp in layers], axis=0)

    w_dt_comb, w_bc = [], []
    for lp in layers:
        dt_rank = lp["w_dt"].shape[0]
        # dt_proj folded into x_proj; kept f32 (dt feeds exp(dt*A)).
        w_dt_comb.append(jnp.dot(lp["w_x"][:, :dt_rank], lp["w_dt"]))
        w_bc.append(lp["w_x"][:, dt_rank:])

    # Production-scale note: choose d_model / d_inner as multiples of 128 so
    # the matmul outputs and stores stay lane-dense (review item #8).
    return dict(
        embedding=raw["embedding"],
        emb_colsum=jnp.sum(raw["embedding"], axis=0, keepdims=True),  # (1, d)
        norm_w=stack("norm_w"),
        w_in=stack("w_in").astype(jnp.bfloat16),
        conv_w=stack("conv_w"),
        conv_b=stack("conv_b"),
        w_dt_comb=jnp.stack(w_dt_comb, 0),                     # f32 dt path
        b_dt=stack("b_dt"),
        w_bc=jnp.stack(w_bc, 0).astype(jnp.bfloat16),          # B/C projection
        A_T=jnp.stack([(-jnp.exp(lp["A_log"])).T for lp in layers], 0),
        D=stack("D"),
        w_out=stack("w_out").astype(jnp.bfloat16),
        norm_f_w=raw["norm_f_w"],
        net_w1=raw["net_w1"], net_b1=raw["net_b1"],
        net_w2=raw["net_w2"], net_b2=raw["net_b2"],
        net_w3=raw["net_w3"], net_b3=raw["net_b3"],
    )


if __name__ == "__main__":
    B, L = 2, 8
    d_model, n_layer, vocab_size = 32, 2, 40     # 40 % 8 == 0 (pad multiple)
    d_state, expand, d_conv = 16, 2, 4

    key = jax.random.PRNGKey(0)
    kp, kx = jax.random.split(key)
    raw_params = init_params(kp, d_model, n_layer, vocab_size,
                             d_state, expand, d_conv)
    prep = prepare_params(raw_params)

    # Float PPG-like signal; also serves (truncated) as embedding indices.
    ppg = jax.random.uniform(kx, (B, L), jnp.float32,
                             minval=0.0, maxval=float(vocab_size))

    out = mamba_forward(ppg, prep)
    out = jax.block_until_ready(out)
    assert out.shape == (B, 1)
    assert bool(jnp.all(jnp.isfinite(out)))
    print("KERNEL_OK")
</pallas_src>

<mosaic_0001>
module attributes {stable_mosaic.version = 11 : i64} {
  func.func @_mamba_fused_kernel(%arg0: i32, %arg1: i32, %arg2: memref<1x8x32xf32, #tpu.memory_space<vmem>>, %arg3: memref<1x1x32xf32, #tpu.memory_space<vmem>>, %arg4: memref<1x32x128xbf16, #tpu.memory_space<vmem>>, %arg5: memref<1x4x64xf32, #tpu.memory_space<vmem>>, %arg6: memref<1x1x64xf32, #tpu.memory_space<vmem>>, %arg7: memref<1x64x64xf32, #tpu.memory_space<vmem>>, %arg8: memref<1x1x64xf32, #tpu.memory_space<vmem>>, %arg9: memref<1x64x32xbf16, #tpu.memory_space<vmem>>, %arg10: memref<1x16x64xf32, #tpu.memory_space<vmem>>, %arg11: memref<1x1x64xf32, #tpu.memory_space<vmem>>, %arg12: memref<1x64x32xbf16, #tpu.memory_space<vmem>>, %arg13: memref<1x32xf32, #tpu.memory_space<vmem>>, %arg14: memref<1x32xf32, #tpu.memory_space<vmem>>, %arg15: memref<1x1x7xf32, #tpu.memory_space<vmem>>, %arg16: memref<8x64xf32, #tpu.memory_space<vmem>>, %arg17: memref<1x64xf32, #tpu.memory_space<vmem>>, %arg18: memref<64x32xf32, #tpu.memory_space<vmem>>, %arg19: memref<1x32xf32, #tpu.memory_space<vmem>>, %arg20: memref<32x1xf32, #tpu.memory_space<vmem>>, %arg21: memref<1x1xf32, #tpu.memory_space<vmem>>, %arg22: memref<1x1x1xf32, #tpu.memory_space<vmem>>, %arg23: memref<8x32xf32, #tpu.memory_space<vmem>>, %arg24: memref<8x64xf32, #tpu.memory_space<vmem>>, %arg25: memref<8x64xf32, #tpu.memory_space<vmem>>, %arg26: memref<8x16xf32, #tpu.memory_space<vmem>>, %arg27: memref<8x16xf32, #tpu.memory_space<vmem>>, %arg28: memref<8x64xf32, #tpu.memory_space<vmem>>) attributes {dimension_semantics = [#tpu.dimension_semantics<parallel>, #tpu.dimension_semantics<arbitrary>], iteration_bounds = array<i64: 2, 2>, scalar_prefetch = 0 : i64, scratch_operands = 6 : i64, tpu.core_type = #tpu.core_type<tc>, window_params = [{transform_indices = @transform_0, window_bounds = array<i64: 1, 8, 32>}, {transform_indices = @transform_1, window_bounds = array<i64: 1, 1, 32>}, {transform_indices = @transform_2, window_bounds = array<i64: 1, 32, 128>}, {transform_indices = @transform_3, window_bounds = array<i64: 1, 4, 64>}, {transform_indices = @transform_4, window_bounds = array<i64: 1, 1, 64>}, {transform_indices = @transform_5, window_bounds = array<i64: 1, 64, 64>}, {transform_indices = @transform_6, window_bounds = array<i64: 1, 1, 64>}, {transform_indices = @transform_7, window_bounds = array<i64: 1, 64, 32>}, {transform_indices = @transform_8, window_bounds = array<i64: 1, 16, 64>}, {transform_indices = @transform_9, window_bounds = array<i64: 1, 1, 64>}, {transform_indices = @transform_10, window_bounds = array<i64: 1, 64, 32>}, {pipeline_mode = #tpu.pipeline_mode<synchronous>, transform_indices = @transform_11, window_bounds = array<i64: 1, 32>}, {pipeline_mode = #tpu.pipeline_mode<synchronous>, transform_indices = @transform_12, window_bounds = array<i64: 1, 32>}, {transform_indices = @transform_13, window_bounds = array<i64: 1, 1, 7>}, {pipeline_mode = #tpu.pipeline_mode<synchronous>, transform_indices = @transform_14, window_bounds = array<i64: 8, 64>}, {pipeline_mode = #tpu.pipeline_mode<synchronous>, transform_indices = @transform_15, window_bounds = array<i64: 1, 64>}, {pipeline_mode = #tpu.pipeline_mode<synchronous>, transform_indices = @transform_16, window_bounds = array<i64: 64, 32>}, {pipeline_mode = #tpu.pipeline_mode<synchronous>, transform_indices = @transform_17, window_bounds = array<i64: 1, 32>}, {pipeline_mode = #tpu.pipeline_mode<synchronous>, transform_indices = @transform_18, window_bounds = array<i64: 32, 1>}, {pipeline_mode = #tpu.pipeline_mode<synchronous>, transform_indices = @transform_19, window_bounds = array<i64: 1, 1>}, {transform_indices = @transform_20, window_bounds = array<i64: 1, 1, 1>}]} {
    %c0_i32 = arith.constant 0 : i32
    %0 = arith.cmpi eq, %arg1, %c0_i32 : i32
    %1 = arith.extui %0 : i1 to i32
    %c0_i32_0 = arith.constant 0 : i32
    %2 = arith.cmpi ne, %1, %c0_i32_0 : i32
    scf.if %2 {
      %c0_84 = arith.constant 0 : index
      %c0_85 = arith.constant 0 : index
      %c0_86 = arith.constant 0 : index
      %262 = vector.load %arg2[%c0_84, %c0_85, %c0_86] : memref<1x8x32xf32, #tpu.memory_space<vmem>>, vector<1x8x32xf32>
      %263 = vector.shape_cast %262 : vector<1x8x32xf32> to vector<8x32xf32>
      %c0_87 = arith.constant 0 : index
      %c0_88 = arith.constant 0 : index
      %264 = vector.load %arg23[%c0_87, %c0_88] : memref<8x32xf32, #tpu.memory_space<vmem>>, vector<8x32xf32>
      tpu.vector_store %arg23[%c0_87, %c0_88], %263 {strides = array<i32>} : memref<8x32xf32, #tpu.memory_space<vmem>>, vector<8x32xf32>,
    } else {
    }
    %c0 = arith.constant 0 : index
    %c0_1 = arith.constant 0 : index
    %3 = vector.load %arg23[%c0, %c0_1] : memref<8x32xf32, #tpu.memory_space<vmem>>, vector<8x32xf32>
    %4 = arith.mulf %3, %3 : vector<8x32xf32>
    %cst = arith.constant dense<0.000000e+00> : vector<8xf32>
    %5 = vector.multi_reduction <add>, %4, %cst [1] : vector<8x32xf32> to vector<8xf32>
    %6 = vector.shape_cast %5 : vector<8xf32> to vector<8x1xf32>
    %cst_2 = arith.constant 3.200000e+01 : f32
    %7 = vector.broadcast %cst_2 : f32 to vector<8x1xf32>
    %8 = arith.divf %6, %7 : vector<8x1xf32>
    %cst_3 = arith.constant 9.99999974E-6 : f32
    %9 = vector.broadcast %cst_3 : f32 to vector<8x1xf32>
    %10 = arith.addf %8, %9 : vector<8x1xf32>
    %11 = math.rsqrt %10 : vector<8x1xf32>
    %12 = vector.broadcast %11 : vector<8x1xf32> to vector<8x32xf32>
    %13 = arith.mulf %3, %12 : vector<8x32xf32>
    %c0_4 = arith.constant 0 : index
    %c0_5 = arith.constant 0 : index
    %c0_6 = arith.constant 0 : index
    %14 = vector.load %arg3[%c0_4, %c0_5, %c0_6] : memref<1x1x32xf32, #tpu.memory_space<vmem>>, vector<1x1x32xf32>
    %15 = vector.shape_cast %14 : vector<1x1x32xf32> to vector<32xf32>
    %16 = vector.shape_cast %15 : vector<32xf32> to vector<1x32xf32>
    %17 = vector.broadcast %16 : vector<1x32xf32> to vector<8x32xf32>
    %18 = arith.mulf %13, %17 : vector<8x32xf32>
    %19 = arith.truncf %18 : vector<8x32xf32> to vector<8x32xbf16>
    %c0_7 = arith.constant 0 : index
    %c0_8 = arith.constant 0 : index
    %c0_9 = arith.constant 0 : index
    %20 = vector.load %arg4[%c0_7, %c0_8, %c0_9] : memref<1x32x128xbf16, #tpu.memory_space<vmem>>, vector<1x32x128xbf16>
    %21 = vector.shape_cast %20 : vector<1x32x128xbf16> to vector<32x128xbf16>
    %cst_10 = arith.constant dense<0.000000e+00> : vector<8x128xf32>
    %22 = tpu.matmul %19, %21, %cst_10 {dimension_numbers = #tpu.dot_dimension_numbers<[1], [0], [0], [1], [0, 0, 1, 1], [], []>} : vector<8x32xbf16>, vector<32x128xbf16>, vector<8x128xf32> -> vector<8x128xf32>
    %23 = vector.extract_strided_slice %22 {offsets = [0, 0], sizes = [8, 64], strides = [1, 1]} : vector<8x128xf32> to vector<8x64xf32>
    %24 = vector.extract_strided_slice %22 {offsets = [0, 64], sizes = [8, 64], strides = [1, 1]} : vector<8x128xf32> to vector<8x64xf32>
    %25 = tpu.iota {dimensions = array<i32: 0>} : vector<8x1xi32>
    %c0_11 = arith.constant 0 : index
    %c3 = arith.constant 3 : index
    %c0_12 = arith.constant 0 : index
    %26 = vector.load %arg5[%c0_11, %c3, %c0_12] : memref<1x4x64xf32, #tpu.memory_space<vmem>>, vector<1x1x64xf32>
    %27 = vector.shape_cast %26 : vector<1x1x64xf32> to vector<64xf32>
    %28 = vector.shape_cast %27 : vector<64xf32> to vector<1x64xf32>
    %29 = vector.broadcast %28 : vector<1x64xf32> to vector<8x64xf32>
    %30 = arith.mulf %23, %29 : vector<8x64xf32>
    %c1_i32 = arith.constant 1 : i32
    %31 = vector.broadcast %c1_i32 : i32 to vector<8x1xi32>
    %32 = arith.cmpi sge, %25, %31 : vector<8x1xi32>
    %c1_i32_13 = arith.constant 1 : i32
    %33 = tpu.dynamic_rotate %23 by %c1_i32_13 dim 0 : vector<8x64xf32>, i32 -> vector<8x64xf32>
    %cst_14 = arith.constant 0.000000e+00 : f32
    %34 = vector.shape_cast %32 : vector<8x1xi1> to vector<8x1xi1>
    %35 = vector.broadcast %34 : vector<8x1xi1> to vector<8x64xi1>
    %36 = vector.broadcast %cst_14 : f32 to vector<8x64xf32>
    %37 = arith.select %35, %33, %36 : vector<8x64xi1>, vector<8x64xf32>
    %c0_15 = arith.constant 0 : index
    %c2 = arith.constant 2 : index
    %c0_16 = arith.constant 0 : index
    %38 = vector.load %arg5[%c0_15, %c2, %c0_16] : memref<1x4x64xf32, #tpu.memory_space<vmem>>, vector<1x1x64xf32>
    %39 = vector.shape_cast %38 : vector<1x1x64xf32> to vector<64xf32>
    %40 = vector.shape_cast %39 : vector<64xf32> to vector<1x64xf32>
    %41 = vector.broadcast %40 : vector<1x64xf32> to vector<8x64xf32>
    %42 = arith.mulf %37, %41 : vector<8x64xf32>
    %43 = arith.addf %30, %42 : vector<8x64xf32>
    %c2_i32 = arith.constant 2 : i32
    %44 = vector.broadcast %c2_i32 : i32 to vector<8x1xi32>
    %45 = arith.cmpi sge, %25, %44 : vector<8x1xi32>
    %c2_i32_17 = arith.constant 2 : i32
    %46 = tpu.dynamic_rotate %23 by %c2_i32_17 dim 0 : vector<8x64xf32>, i32 -> vector<8x64xf32>
    %cst_18 = arith.constant 0.000000e+00 : f32
    %47 = vector.shape_cast %45 : vector<8x1xi1> to vector<8x1xi1>
    %48 = vector.broadcast %47 : vector<8x1xi1> to vector<8x64xi1>
    %49 = vector.broadcast %cst_18 : f32 to vector<8x64xf32>
    %50 = arith.select %48, %46, %49 : vector<8x64xi1>, vector<8x64xf32>
    %c0_19 = arith.constant 0 : index
    %c1 = arith.constant 1 : index
    %c0_20 = arith.constant 0 : index
    %51 = vector.load %arg5[%c0_19, %c1, %c0_20] : memref<1x4x64xf32, #tpu.memory_space<vmem>>, vector<1x1x64xf32>
    %52 = vector.shape_cast %51 : vector<1x1x64xf32> to vector<64xf32>
    %53 = vector.shape_cast %52 : vector<64xf32> to vector<1x64xf32>
    %54 = vector.broadcast %53 : vector<1x64xf32> to vector<8x64xf32>
    %55 = arith.mulf %50, %54 : vector<8x64xf32>
    %56 = arith.addf %43, %55 : vector<8x64xf32>
    %c3_i32 = arith.constant 3 : i32
    %57 = vector.broadcast %c3_i32 : i32 to vector<8x1xi32>
    %58 = arith.cmpi sge, %25, %57 : vector<8x1xi32>
    %c3_i32_21 = arith.constant 3 : i32
    %59 = tpu.dynamic_rotate %23 by %c3_i32_21 dim 0 : vector<8x64xf32>, i32 -> vector<8x64xf32>
    %cst_22 = arith.constant 0.000000e+00 : f32
    %60 = vector.shape_cast %58 : vector<8x1xi1> to vector<8x1xi1>
    %61 = vector.broadcast %60 : vector<8x1xi1> to vector<8x64xi1>
    %62 = vector.broadcast %cst_22 : f32 to vector<8x64xf32>
    %63 = arith.select %61, %59, %62 : vector<8x64xi1>, vector<8x64xf32>
    %c0_23 = arith.constant 0 : index
    %c0_24 = arith.constant 0 : index
    %c0_25 = arith.constant 0 : index
    %64 = vector.load %arg5[%c0_23, %c0_24, %c0_25] : memref<1x4x64xf32, #tpu.memory_space<vmem>>, vector<1x1x64xf32>
    %65 = vector.shape_cast %64 : vector<1x1x64xf32> to vector<64xf32>
    %66 = vector.shape_cast %65 : vector<64xf32> to vector<1x64xf32>
    %67 = vector.broadcast %66 : vector<1x64xf32> to vector<8x64xf32>
    %68 = arith.mulf %63, %67 : vector<8x64xf32>
    %69 = arith.addf %56, %68 : vector<8x64xf32>
    %c0_26 = arith.constant 0 : index
    %c0_27 = arith.constant 0 : index
    %c0_28 = arith.constant 0 : index
    %70 = vector.load %arg6[%c0_26, %c0_27, %c0_28] : memref<1x1x64xf32, #tpu.memory_space<vmem>>, vector<1x1x64xf32>
    %71 = vector.shape_cast %70 : vector<1x1x64xf32> to vector<64xf32>
    %72 = vector.shape_cast %71 : vector<64xf32> to vector<1x64xf32>
    %73 = vector.broadcast %72 : vector<1x64xf32> to vector<8x64xf32>
    %74 = arith.addf %69, %73 : vector<8x64xf32>
    %75 = arith.negf %74 : vector<8x64xf32>
    %76 = math.exp %75 : vector<8x64xf32>
    %cst_29 = arith.constant 1.000000e+00 : f32
    %77 = vector.broadcast %cst_29 : f32 to vector<8x64xf32>
    %78 = arith.addf %77, %76 : vector<8x64xf32>
    %79 = arith.divf %77, %78 : vector<8x64xf32>
    %80 = arith.mulf %74, %79 : vector<8x64xf32>
    %c0_30 = arith.constant 0 : index
    %c0_31 = arith.constant 0 : index
    %c0_32 = arith.constant 0 : index
    %81 = vector.load %arg7[%c0_30, %c0_31, %c0_32] : memref<1x64x64xf32, #tpu.memory_space<vmem>>, vector<1x64x64xf32>
    %82 = vector.shape_cast %81 : vector<1x64x64xf32> to vector<64x64xf32>
    %cst_33 = arith.constant dense<0.000000e+00> : vector<8x64xf32>
    %83 = tpu.matmul %80, %82, %cst_33 {dimension_numbers = #tpu.dot_dimension_numbers<[1], [0], [0], [1], [0, 0, 1, 1], [], []>} : vector<8x64xf32>, vector<64x64xf32>, vector<8x64xf32> -> vector<8x64xf32>
    %c0_34 = arith.constant 0 : index
    %c0_35 = arith.constant 0 : index
    %c0_36 = arith.constant 0 : index
    %84 = vector.load %arg8[%c0_34, %c0_35, %c0_36] : memref<1x1x64xf32, #tpu.memory_space<vmem>>, vector<1x1x64xf32>
    %85 = vector.shape_cast %84 : vector<1x1x64xf32> to vector<64xf32>
    %86 = vector.shape_cast %85 : vector<64xf32> to vector<1x64xf32>
    %87 = vector.broadcast %86 : vector<1x64xf32> to vector<8x64xf32>
    %88 = arith.addf %83, %87 : vector<8x64xf32>
    %cst_37 = arith.constant 0.000000e+00 : f32
    %89 = vector.broadcast %cst_37 : f32 to vector<8x64xf32>
    %90 = arith.maximumf %88, %89 : vector<8x64xf32>
    %91 = math.absf %88 : vector<8x64xf32>
    %cst_38 = arith.constant 0.000000e+00 : f32
    %92 = vector.broadcast %cst_38 : f32 to vector<8x64xf32>
    %93 = arith.subf %92, %91 : vector<8x64xf32>
    %94 = math.exp %93 : vector<8x64xf32>
    %95 = math.log1p %94 : vector<8x64xf32>
    %96 = arith.addf %90, %95 : vector<8x64xf32>
    %97 = arith.truncf %80 : vector<8x64xf32> to vector<8x64xbf16>
    %c0_39 = arith.constant 0 : index
    %c0_40 = arith.constant 0 : index
    %c0_41 = arith.constant 0 : index
    %98 = vector.load %arg9[%c0_39, %c0_40, %c0_41] : memref<1x64x32xbf16, #tpu.memory_space<vmem>>, vector<1x64x32xbf16>
    %99 = vector.shape_cast %98 : vector<1x64x32xbf16> to vector<64x32xbf16>
    %cst_42 = arith.constant dense<0.000000e+00> : vector<8x32xf32>
    %100 = tpu.matmul %97, %99, %cst_42 {dimension_numbers = #tpu.dot_dimension_numbers<[1], [0], [0], [1], [0, 0, 1, 1], [], []>} : vector<8x64xbf16>, vector<64x32xbf16>, vector<8x32xf32> -> vector<8x32xf32>
    %c0_43 = arith.constant 0 : index
    %c0_44 = arith.constant 0 : index
    %101 = vector.load %arg24[%c0_43, %c0_44] : memref<8x64xf32, #tpu.memory_space<vmem>>, vector<8x64xf32>
    tpu.vector_store %arg24[%c0_43, %c0_44], %96 {strides = array<i32>} : memref<8x64xf32, #tpu.memory_space<vmem>>, vector<8x64xf32>,
    %102 = arith.mulf %96, %80 : vector<8x64xf32>
    %c0_45 = arith.constant 0 : index
    %c0_46 = arith.constant 0 : index
    %103 = vector.load %arg25[%c0_45, %c0_46] : memref<8x64xf32, #tpu.memory_space<vmem>>, vector<8x64xf32>
    tpu.vector_store %arg25[%c0_45, %c0_46], %102 {strides = array<i32>} : memref<8x64xf32, #tpu.memory_space<vmem>>, vector<8x64xf32>,
    %104 = vector.extract_strided_slice %100 {offsets = [0, 0], sizes = [8, 16], strides = [1, 1]} : vector<8x32xf32> to vector<8x16xf32>
    %c0_47 = arith.constant 0 : index
    %c0_48 = arith.constant 0 : index
    %105 = vector.load %arg26[%c0_47, %c0_48] : memref<8x16xf32, #tpu.memory_space<vmem>>, vector<8x16xf32>
    tpu.vector_store %arg26[%c0_47, %c0_48], %104 {strides = array<i32>} : memref<8x16xf32, #tpu.memory_space<vmem>>, vector<8x16xf32>,
    %106 = vector.extract_strided_slice %100 {offsets = [0, 16], sizes = [8, 16], strides = [1, 1]} : vector<8x32xf32> to vector<8x16xf32>
    %c0_49 = arith.constant 0 : index
    %c0_50 = arith.constant 0 : index
    %107 = vector.load %arg27[%c0_49, %c0_50] : memref<8x16xf32, #tpu.memory_space<vmem>>, vector<8x16xf32>
    tpu.vector_store %arg27[%c0_49, %c0_50], %106 {strides = array<i32>} : memref<8x16xf32, #tpu.memory_space<vmem>>, vector<8x16xf32>,
    %c0_51 = arith.constant 0 : index
    %c0_52 = arith.constant 0 : index
    %c0_53 = arith.constant 0 : index
    %108 = vector.load %arg10[%c0_51, %c0_52, %c0_53] : memref<1x16x64xf32, #tpu.memory_space<vmem>>, vector<1x16x64xf32>
    %109 = vector.shape_cast %108 : vector<1x16x64xf32> to vector<16x64xf32>
    %cst_54 = arith.constant 0.000000e+00 : f32
    %110 = vector.broadcast %cst_54 : f32 to vector<16x64xf32>
    %c0_i32_55 = arith.constant 0 : i32
    %c8_i32 = arith.constant 8 : i32
    %111 = arith.muli %c0_i32_55, %c8_i32 : i32
    %112 = tpu.assume_multiple %111, 8 : i32
    %113 = arith.index_cast %112 : i32 to index
    %c0_56 = arith.constant 0 : index
    %114 = vector.load %arg24[%113, %c0_56] : memref<8x64xf32, #tpu.memory_space<vmem>>, vector<8x64xf32>
    %115 = arith.index_cast %112 : i32 to index
    %c0_57 = arith.constant 0 : index
    %116 = vector.load %arg25[%115, %c0_57] : memref<8x64xf32, #tpu.memory_space<vmem>>, vector<8x64xf32>
    %117 = arith.index_cast %112 : i32 to index
    %c0_58 = arith.constant 0 : index
    %118 = vector.load %arg26[%117, %c0_58] : memref<8x16xf32, #tpu.memory_space<vmem>>, vector<8x16xf32>
    %119 = arith.index_cast %112 : i32 to index
    %c0_59 = arith.constant 0 : index
    %120 = vector.load %arg27[%119, %c0_59] : memref<8x16xf32, #tpu.memory_space<vmem>>, vector<8x16xf32>
    %121 = vector.shape_cast %114 : vector<8x64xf32> to vector<8x1x64xf32>
    %122 = vector.shape_cast %109 : vector<16x64xf32> to vector<1x16x64xf32>
    %123 = vector.broadcast %121 : vector<8x1x64xf32> to vector<8x16x64xf32>
    %124 = vector.broadcast %122 : vector<1x16x64xf32> to vector<8x16x64xf32>
    %125 = arith.mulf %123, %124 : vector<8x16x64xf32>
    %126 = math.exp %125 : vector<8x16x64xf32>
    %127 = vector.shape_cast %118 : vector<8x16xf32> to vector<8x16x1xf32>
    %128 = vector.shape_cast %116 : vector<8x64xf32> to vector<8x1x64xf32>
    %129 = vector.broadcast %127 : vector<8x16x1xf32> to vector<8x16x64xf32>
    %130 = vector.broadcast %128 : vector<8x1x64xf32> to vector<8x16x64xf32>
    %131 = arith.mulf %129, %130 : vector<8x16x64xf32>
    %132 = vector.extract_strided_slice %126 {offsets = [0, 0, 0], sizes = [1, 16, 64], strides = [1, 1, 1]} : vector<8x16x64xf32> to vector<1x16x64xf32>
    %133 = vector.shape_cast %132 : vector<1x16x64xf32> to vector<16x64xf32>
    %134 = arith.mulf %133, %110 : vector<16x64xf32>
    %135 = vector.extract_strided_slice %131 {offsets = [0, 0, 0], sizes = [1, 16, 64], strides = [1, 1, 1]} : vector<8x16x64xf32> to vector<1x16x64xf32>
    %136 = vector.shape_cast %135 : vector<1x16x64xf32> to vector<16x64xf32>
    %137 = arith.addf %134, %136 : vector<16x64xf32>
    %138 = vector.extract_strided_slice %120 {offsets = [0, 0], sizes = [1, 16], strides = [1, 1]} : vector<8x16xf32> to vector<1x16xf32>
    %139 = vector.shape_cast %138 : vector<1x16xf32> to vector<16xf32>
    %140 = vector.shape_cast %139 : vector<16xf32> to vector<16x1xf32>
    %141 = vector.broadcast %140 : vector<16x1xf32> to vector<16x64xf32>
    %142 = arith.mulf %137, %141 : vector<16x64xf32>
    %cst_60 = arith.constant dense<0.000000e+00> : vector<64xf32>
    %143 = vector.multi_reduction <add>, %142, %cst_60 [0] : vector<16x64xf32> to vector<64xf32>
    %144 = vector.shape_cast %143 : vector<64xf32> to vector<1x64xf32>
    %145 = vector.extract_strided_slice %126 {offsets = [1, 0, 0], sizes = [1, 16, 64], strides = [1, 1, 1]} : vector<8x16x64xf32> to vector<1x16x64xf32>
    %146 = vector.shape_cast %145 : vector<1x16x64xf32> to vector<16x64xf32>
    %147 = arith.mulf %146, %137 : vector<16x64xf32>
    %148 = vector.extract_strided_slice %131 {offsets = [1, 0, 0], sizes = [1, 16, 64], strides = [1, 1, 1]} : vector<8x16x64xf32> to vector<1x16x64xf32>
    %149 = vector.shape_cast %148 : vector<1x16x64xf32> to vector<16x64xf32>
    %150 = arith.addf %147, %149 : vector<16x64xf32>
    %151 = vector.extract_strided_slice %120 {offsets = [1, 0], sizes = [1, 16], strides = [1, 1]} : vector<8x16xf32> to vector<1x16xf32>
    %152 = vector.shape_cast %151 : vector<1x16xf32> to vector<16xf32>
    %153 = vector.shape_cast %152 : vector<16xf32> to vector<16x1xf32>
    %154 = vector.broadcast %153 : vector<16x1xf32> to vector<16x64xf32>
    %155 = arith.mulf %150, %154 : vector<16x64xf32>
    %cst_61 = arith.constant dense<0.000000e+00> : vector<64xf32>
    %156 = vector.multi_reduction <add>, %155, %cst_61 [0] : vector<16x64xf32> to vector<64xf32>
    %157 = vector.shape_cast %156 : vector<64xf32> to vector<1x64xf32>
    %158 = vector.extract_strided_slice %126 {offsets = [2, 0, 0], sizes = [1, 16, 64], strides = [1, 1, 1]} : vector<8x16x64xf32> to vector<1x16x64xf32>
    %159 = vector.shape_cast %158 : vector<1x16x64xf32> to vector<16x64xf32>
    %160 = arith.mulf %159, %150 : vector<16x64xf32>
    %161 = vector.extract_strided_slice %131 {offsets = [2, 0, 0], sizes = [1, 16, 64], strides = [1, 1, 1]} : vector<8x16x64xf32> to vector<1x16x64xf32>
    %162 = vector.shape_cast %161 : vector<1x16x64xf32> to vector<16x64xf32>
    %163 = arith.addf %160, %162 : vector<16x64xf32>
    %164 = vector.extract_strided_slice %120 {offsets = [2, 0], sizes = [1, 16], strides = [1, 1]} : vector<8x16xf32> to vector<1x16xf32>
    %165 = vector.shape_cast %164 : vector<1x16xf32> to vector<16xf32>
    %166 = vector.shape_cast %165 : vector<16xf32> to vector<16x1xf32>
    %167 = vector.broadcast %166 : vector<16x1xf32> to vector<16x64xf32>
    %168 = arith.mulf %163, %167 : vector<16x64xf32>
    %cst_62 = arith.constant dense<0.000000e+00> : vector<64xf32>
    %169 = vector.multi_reduction <add>, %168, %cst_62 [0] : vector<16x64xf32> to vector<64xf32>
    %170 = vector.shape_cast %169 : vector<64xf32> to vector<1x64xf32>
    %171 = vector.extract_strided_slice %126 {offsets = [3, 0, 0], sizes = [1, 16, 64], strides = [1, 1, 1]} : vector<8x16x64xf32> to vector<1x16x64xf32>
    %172 = vector.shape_cast %171 : vector<1x16x64xf32> to vector<16x64xf32>
    %173 = arith.mulf %172, %163 : vector<16x64xf32>
    %174 = vector.extract_strided_slice %131 {offsets = [3, 0, 0], sizes = [1, 16, 64], strides = [1, 1, 1]} : vector<8x16x64xf32> to vector<1x16x64xf32>
    %175 = vector.shape_cast %174 : vector<1x16x64xf32> to vector<16x64xf32>
    %176 = arith.addf %173, %175 : vector<16x64xf32>
    %177 = vector.extract_strided_slice %120 {offsets = [3, 0], sizes = [1, 16], strides = [1, 1]} : vector<8x16xf32> to vector<1x16xf32>
    %178 = vector.shape_cast %177 : vector<1x16xf32> to vector<16xf32>
    %179 = vector.shape_cast %178 : vector<16xf32> to vector<16x1xf32>
    %180 = vector.broadcast %179 : vector<16x1xf32> to vector<16x64xf32>
    %181 = arith.mulf %176, %180 : vector<16x64xf32>
    %cst_63 = arith.constant dense<0.000000e+00> : vector<64xf32>
    %182 = vector.multi_reduction <add>, %181, %cst_63 [0] : vector<16x64xf32> to vector<64xf32>
    %183 = vector.shape_cast %182 : vector<64xf32> to vector<1x64xf32>
    %184 = vector.extract_strided_slice %126 {offsets = [4, 0, 0], sizes = [1, 16, 64], strides = [1, 1, 1]} : vector<8x16x64xf32> to vector<1x16x64xf32>
    %185 = vector.shape_cast %184 : vector<1x16x64xf32> to vector<16x64xf32>
    %186 = arith.mulf %185, %176 : vector<16x64xf32>
    %187 = vector.extract_strided_slice %131 {offsets = [4, 0, 0], sizes = [1, 16, 64], strides = [1, 1, 1]} : vector<8x16x64xf32> to vector<1x16x64xf32>
    %188 = vector.shape_cast %187 : vector<1x16x64xf32> to vector<16x64xf32>
    %189 = arith.addf %186, %188 : vector<16x64xf32>
    %190 = vector.extract_strided_slice %120 {offsets = [4, 0], sizes = [1, 16], strides = [1, 1]} : vector<8x16xf32> to vector<1x16xf32>
    %191 = vector.shape_cast %190 : vector<1x16xf32> to vector<16xf32>
    %192 = vector.shape_cast %191 : vector<16xf32> to vector<16x1xf32>
    %193 = vector.broadcast %192 : vector<16x1xf32> to vector<16x64xf32>
    %194 = arith.mulf %189, %193 : vector<16x64xf32>
    %cst_64 = arith.constant dense<0.000000e+00> : vector<64xf32>
    %195 = vector.multi_reduction <add>, %194, %cst_64 [0] : vector<16x64xf32> to vector<64xf32>
    %196 = vector.shape_cast %195 : vector<64xf32> to vector<1x64xf32>
    %197 = vector.extract_strided_slice %126 {offsets = [5, 0, 0], sizes = [1, 16, 64], strides = [1, 1, 1]} : vector<8x16x64xf32> to vector<1x16x64xf32>
    %198 = vector.shape_cast %197 : vector<1x16x64xf32> to vector<16x64xf32>
    %199 = arith.mulf %198, %189 : vector<16x64xf32>
    %200 = vector.extract_strided_slice %131 {offsets = [5, 0, 0], sizes = [1, 16, 64], strides = [1, 1, 1]} : vector<8x16x64xf32> to vector<1x16x64xf32>
    %201 = vector.shape_cast %200 : vector<1x16x64xf32> to vector<16x64xf32>
    %202 = arith.addf %199, %201 : vector<16x64xf32>
    %203 = vector.extract_strided_slice %120 {offsets = [5, 0], sizes = [1, 16], strides = [1, 1]} : vector<8x16xf32> to vector<1x16xf32>
    %204 = vector.shape_cast %203 : vector<1x16xf32> to vector<16xf32>
    %205 = vector.shape_cast %204 : vector<16xf32> to vector<16x1xf32>
    %206 = vector.broadcast %205 : vector<16x1xf32> to vector<16x64xf32>
    %207 = arith.mulf %202, %206 : vector<16x64xf32>
    %cst_65 = arith.constant dense<0.000000e+00> : vector<64xf32>
    %208 = vector.multi_reduction <add>, %207, %cst_65 [0] : vector<16x64xf32> to vector<64xf32>
    %209 = vector.shape_cast %208 : vector<64xf32> to vector<1x64xf32>
    %210 = vector.extract_strided_slice %126 {offsets = [6, 0, 0], sizes = [1, 16, 64], strides = [1, 1, 1]} : vector<8x16x64xf32> to vector<1x16x64xf32>
    %211 = vector.shape_cast %210 : vector<1x16x64xf32> to vector<16x64xf32>
    %212 = arith.mulf %211, %202 : vector<16x64xf32>
    %213 = vector.extract_strided_slice %131 {offsets = [6, 0, 0], sizes = [1, 16, 64], strides = [1, 1, 1]} : vector<8x16x64xf32> to vector<1x16x64xf32>
    %214 = vector.shape_cast %213 : vector<1x16x64xf32> to vector<16x64xf32>
    %215 = arith.addf %212, %214 : vector<16x64xf32>
    %216 = vector.extract_strided_slice %120 {offsets = [6, 0], sizes = [1, 16], strides = [1, 1]} : vector<8x16xf32> to vector<1x16xf32>
    %217 = vector.shape_cast %216 : vector<1x16xf32> to vector<16xf32>
    %218 = vector.shape_cast %217 : vector<16xf32> to vector<16x1xf32>
    %219 = vector.broadcast %218 : vector<16x1xf32> to vector<16x64xf32>
    %220 = arith.mulf %215, %219 : vector<16x64xf32>
    %cst_66 = arith.constant dense<0.000000e+00> : vector<64xf32>
    %221 = vector.multi_reduction <add>, %220, %cst_66 [0] : vector<16x64xf32> to vector<64xf32>
    %222 = vector.shape_cast %221 : vector<64xf32> to vector<1x64xf32>
    %223 = vector.extract_strided_slice %126 {offsets = [7, 0, 0], sizes = [1, 16, 64], strides = [1, 1, 1]} : vector<8x16x64xf32> to vector<1x16x64xf32>
    %224 = vector.shape_cast %223 : vector<1x16x64xf32> to vector<16x64xf32>
    %225 = arith.mulf %224, %215 : vector<16x64xf32>
    %226 = vector.extract_strided_slice %131 {offsets = [7, 0, 0], sizes = [1, 16, 64], strides = [1, 1, 1]} : vector<8x16x64xf32> to vector<1x16x64xf32>
    %227 = vector.shape_cast %226 : vector<1x16x64xf32> to vector<16x64xf32>
    %228 = arith.addf %225, %227 : vector<16x64xf32>
    %229 = vector.extract_strided_slice %120 {offsets = [7, 0], sizes = [1, 16], strides = [1, 1]} : vector<8x16xf32> to vector<1x16xf32>
    %230 = vector.shape_cast %229 : vector<1x16xf32> to vector<16xf32>
    %231 = vector.shape_cast %230 : vector<16xf32> to vector<16x1xf32>
    %232 = vector.broadcast %231 : vector<16x1xf32> to vector<16x64xf32>
    %233 = arith.mulf %228, %232 : vector<16x64xf32>
    %cst_67 = arith.constant dense<0.000000e+00> : vector<64xf32>
    %234 = vector.multi_reduction <add>, %233, %cst_67 [0] : vector<16x64xf32> to vector<64xf32>
    %235 = vector.shape_cast %234 : vector<64xf32> to vector<1x64xf32>
    %236 = tpu.concatenate %144, %157, %170, %183, %196, %209, %222, %235 in 0 : vector<1x64xf32>, vector<1x64xf32>, vector<1x64xf32>, vector<1x64xf32>, vector<1x64xf32>, vector<1x64xf32>, vector<1x64xf32>, vector<1x64xf32> -> vector<8x64xf32>
    %237 = arith.index_cast %112 : i32 to index
    %c0_68 = arith.constant 0 : index
    %238 = vector.load %arg28[%237, %c0_68] : memref<8x64xf32, #tpu.memory_space<vmem>>, vector<8x64xf32>
    tpu.vector_store %arg28[%237, %c0_68], %236 {strides = array<i32>} : memref<8x64xf32, #tpu.memory_space<vmem>>, vector<8x64xf32>,
    %c1_i32_69 = arith.constant 1 : i32
    %c0_70 = arith.constant 0 : index
    %c0_71 = arith.constant 0 : index
    %239 = vector.load %arg28[%c0_70, %c0_71] : memref<8x64xf32, #tpu.memory_space<vmem>>, vector<8x64xf32>
    %c0_72 = arith.constant 0 : index
    %c0_73 = arith.constant 0 : index
    %c0_74 = arith.constant 0 : index
    %240 = vector.load %arg11[%c0_72, %c0_73, %c0_74] : memref<1x1x64xf32, #tpu.memory_space<vmem>>, vector<1x1x64xf32>
    %241 = vector.shape_cast %240 : vector<1x1x64xf32> to vector<64xf32>
    %242 = vector.shape_cast %241 : vector<64xf32> to vector<1x64xf32>
    %243 = vector.broadcast %242 : vector<1x64xf32> to vector<8x64xf32>
    %244 = arith.mulf %80, %243 : vector<8x64xf32>
    %245 = arith.addf %239, %244 : vector<8x64xf32>
    %246 = arith.negf %24 : vector<8x64xf32>
    %247 = math.exp %246 : vector<8x64xf32>
    %cst_75 = arith.constant 1.000000e+00 : f32
    %248 = vector.broadcast %cst_75 : f32 to vector<8x64xf32>
    %249 = arith.addf %248, %247 : vector<8x64xf32>
    %250 = arith.divf %248, %249 : vector<8x64xf32>
    %251 = arith.mulf %24, %250 : vector<8x64xf32>
    %252 = arith.mulf %245, %251 : vector<8x64xf32>
    %253 = arith.truncf %252 : vector<8x64xf32> to vector<8x64xbf16>
    %c0_76 = arith.constant 0 : index
    %c0_77 = arith.constant 0 : index
    %c0_78 = arith.constant 0 : index
    %254 = vector.load %arg12[%c0_76, %c0_77, %c0_78] : memref<1x64x32xbf16, #tpu.memory_space<vmem>>, vector<1x64x32xbf16>
    %255 = vector.shape_cast %254 : vector<1x64x32xbf16> to vector<64x32xbf16>
    %cst_79 = arith.constant dense<0.000000e+00> : vector<8x32xf32>
    %256 = tpu.matmul %253, %255, %cst_79 {dimension_numbers = #tpu.dot_dimension_numbers<[1], [0], [0], [1], [0, 0, 1, 1], [], []>} : vector<8x64xbf16>, vector<64x32xbf16>, vector<8x32xf32> -> vector<8x32xf32>
    %257 = arith.addf %3, %256 : vector<8x32xf32>
    %c0_80 = arith.constant 0 : index
    %c0_81 = arith.constant 0 : index
    %258 = vector.load %arg23[%c0_80, %c0_81] : memref<8x32xf32, #tpu.memory_space<vmem>>, vector<8x32xf32>
    tpu.vector_store %arg23[%c0_80, %c0_81], %257 {strides = array<i32>} : memref<8x32xf32, #tpu.memory_space<vmem>>, vector<8x32xf32>,
    %c1_i32_82 = arith.constant 1 : i32
    %259 = arith.cmpi eq, %arg1, %c1_i32_82 : i32
    %260 = arith.extui %259 : i1 to i32
    %c0_i32_83 = arith.constant 0 : i32
    %261 = arith.cmpi ne, %260, %c0_i32_83 : i32
    scf.if %261 {
      %262 = arith.mulf %257, %257 : vector<8x32xf32>
      %cst_84 = arith.constant dense<0.000000e+00> : vector<8xf32>
      %263 = vector.multi_reduction <add>, %262, %cst_84 [1] : vector<8x32xf32> to vector<8xf32>
      %264 = vector.shape_cast %263 : vector<8xf32> to vector<8x1xf32>
      %cst_85 = arith.constant 3.200000e+01 : f32
      %265 = vector.broadcast %cst_85 : f32 to vector<8x1xf32>
      %266 = arith.divf %264, %265 : vector<8x1xf32>
      %cst_86 = arith.constant 9.99999974E-6 : f32
      %267 = vector.broadcast %cst_86 : f32 to vector<8x1xf32>
      %268 = arith.addf %266, %267 : vector<8x1xf32>
      %269 = math.rsqrt %268 : vector<8x1xf32>
      %270 = vector.broadcast %269 : vector<8x1xf32> to vector<8x32xf32>
      %271 = arith.mulf %257, %270 : vector<8x32xf32>
      %c0_87 = arith.constant 0 : index
      %c0_88 = arith.constant 0 : index
      %272 = vector.load %arg13[%c0_87, %c0_88] : memref<1x32xf32, #tpu.memory_space<vmem>>, vector<1x32xf32>
      %273 = vector.shape_cast %272 : vector<1x32xf32> to vector<32xf32>
      %274 = vector.shape_cast %273 : vector<32xf32> to vector<1x32xf32>
      %275 = vector.broadcast %274 : vector<1x32xf32> to vector<8x32xf32>
      %276 = arith.mulf %271, %275 : vector<8x32xf32>
      %c0_89 = arith.constant 0 : index
      %c0_90 = arith.constant 0 : index
      %277 = vector.load %arg14[%c0_89, %c0_90] : memref<1x32xf32, #tpu.memory_space<vmem>>, vector<1x32xf32>
      %278 = vector.shape_cast %277 : vector<1x32xf32> to vector<32xf32>
      %279 = vector.shape_cast %278 : vector<32xf32> to vector<1x32xf32>
      %280 = vector.broadcast %279 : vector<1x32xf32> to vector<8x32xf32>
      %281 = arith.mulf %276, %280 : vector<8x32xf32>
      %cst_91 = arith.constant dense<0.000000e+00> : vector<8xf32>
      %282 = vector.multi_reduction <add>, %281, %cst_91 [1] : vector<8x32xf32> to vector<8xf32>
      %283 = vector.shape_cast %282 : vector<8xf32> to vector<8x1xf32>
      %c8_i32_92 = arith.constant 8 : i32
      %284 = vector.broadcast %c8_i32_92 : i32 to vector<8x1xi32>
      %285 = arith.cmpi slt, %25, %284 : vector<8x1xi32>
      %cst_93 = arith.constant 0.000000e+00 : f32
      %286 = vector.broadcast %cst_93 : f32 to vector<8x1xf32>
      %287 = arith.select %285, %283, %286 : vector<8x1xi1>, vector<8x1xf32>
      %cst_94 = arith.constant dense<0.000000e+00> : vector<1xf32>
      %288 = vector.multi_reduction <add>, %287, %cst_94 [0] : vector<8x1xf32> to vector<1xf32>
      %289 = vector.shape_cast %288 : vector<1xf32> to vector<1x1xf32>
      %cst_95 = arith.constant 3.125000e-03 : f32
      %290 = vector.broadcast %cst_95 : f32 to vector<1x1xf32>
      %291 = arith.mulf %289, %290 : vector<1x1xf32>
      %c0_96 = arith.constant 0 : index
      %c0_97 = arith.constant 0 : index
      %c0_98 = arith.constant 0 : index
      %292 = vector.load %arg15[%c0_96, %c0_97, %c0_98] : memref<1x1x7xf32, #tpu.memory_space<vmem>>, vector<1x1x7xf32>
      %293 = vector.shape_cast %292 : vector<1x1x7xf32> to vector<1x7xf32>
      %294 = tpu.concatenate %291, %293 in 1 : vector<1x1xf32>, vector<1x7xf32> -> vector<1x8xf32>
      %c0_99 = arith.constant 0 : index
      %c0_100 = arith.constant 0 : index
      %295 = vector.load %arg16[%c0_99, %c0_100] : memref<8x64xf32, #tpu.memory_space<vmem>>, vector<8x64xf32>
      %cst_101 = arith.constant dense<0.000000e+00> : vector<1x64xf32>
      %296 = tpu.matmul %294, %295, %cst_101 {dimension_numbers = #tpu.dot_dimension_numbers<[1], [0], [0], [1], [0, 0, 1, 1], [], []>} : vector<1x8xf32>, vector<8x64xf32>, vector<1x64xf32> -> vector<1x64xf32>
      %c0_102 = arith.constant 0 : index
      %c0_103 = arith.constant 0 : index
      %297 = vector.load %arg17[%c0_102, %c0_103] : memref<1x64xf32, #tpu.memory_space<vmem>>, vector<1x64xf32>
      %298 = vector.shape_cast %297 : vector<1x64xf32> to vector<64xf32>
      %299 = vector.shape_cast %298 : vector<64xf32> to vector<1x64xf32>
      %300 = arith.addf %296, %299 : vector<1x64xf32>
      %cst_104 = arith.constant 0.000000e+00 : f32
      %301 = vector.broadcast %cst_104 : f32 to vector<1x64xf32>
      %302 = arith.cmpf ogt, %300, %301 : vector<1x64xf32>
      %cst_105 = arith.constant 0.000000e+00 : f32
      %303 = vector.broadcast %cst_105 : f32 to vector<1x64xf32>
      %304 = arith.minimumf %300, %303 : vector<1x64xf32>
      %305 = math.exp %304 : vector<1x64xf32>
      %cst_106 = arith.constant 1.000000e+00 : f32
      %306 = vector.broadcast %cst_106 : f32 to vector<1x64xf32>
      %307 = arith.subf %305, %306 : vector<1x64xf32>
      %308 = arith.select %302, %300, %307 : vector<1x64xi1>, vector<1x64xf32>
      %c0_107 = arith.constant 0 : index
      %c0_108 = arith.constant 0 : index
      %309 = vector.load %arg18[%c0_107, %c0_108] : memref<64x32xf32, #tpu.memory_space<vmem>>, vector<64x32xf32>
      %cst_109 = arith.constant dense<0.000000e+00> : vector<1x32xf32>
      %310 = tpu.matmul %308, %309, %cst_109 {dimension_numbers = #tpu.dot_dimension_numbers<[1], [0], [0], [1], [0, 0, 1, 1], [], []>} : vector<1x64xf32>, vector<64x32xf32>, vector<1x32xf32> -> vector<1x32xf32>
      %c0_110 = arith.constant 0 : index
      %c0_111 = arith.constant 0 : index
      %311 = vector.load %arg19[%c0_110, %c0_111] : memref<1x32xf32, #tpu.memory_space<vmem>>, vector<1x32xf32>
      %312 = vector.shape_cast %311 : vector<1x32xf32> to vector<32xf32>
      %313 = vector.shape_cast %312 : vector<32xf32> to vector<1x32xf32>
      %314 = arith.addf %310, %313 : vector<1x32xf32>
      %cst_112 = arith.constant 0.000000e+00 : f32
      %315 = vector.broadcast %cst_112 : f32 to vector<1x32xf32>
      %316 = arith.cmpf ogt, %314, %315 : vector<1x32xf32>
      %cst_113 = arith.constant 0.000000e+00 : f32
      %317 = vector.broadcast %cst_113 : f32 to vector<1x32xf32>
      %318 = arith.minimumf %314, %317 : vector<1x32xf32>
      %319 = math.exp %318 : vector<1x32xf32>
      %cst_114 = arith.constant 1.000000e+00 : f32
      %320 = vector.broadcast %cst_114 : f32 to vector<1x32xf32>
      %321 = arith.subf %319, %320 : vector<1x32xf32>
      %322 = arith.select %316, %314, %321 : vector<1x32xi1>, vector<1x32xf32>
      %c0_115 = arith.constant 0 : index
      %c0_116 = arith.constant 0 : index
      %323 = vector.load %arg20[%c0_115, %c0_116] : memref<32x1xf32, #tpu.memory_space<vmem>>, vector<32x1xf32>
      %cst_117 = arith.constant dense<0.000000e+00> : vector<1x1xf32>
      %324 = tpu.matmul %322, %323, %cst_117 {dimension_numbers = #tpu.dot_dimension_numbers<[1], [0], [0], [1], [0, 0, 1, 1], [], []>} : vector<1x32xf32>, vector<32x1xf32>, vector<1x1xf32> -> vector<1x1xf32>
      %c0_118 = arith.constant 0 : index
      %c0_119 = arith.constant 0 : index
      %325 = vector.load %arg21[%c0_118, %c0_119] : memref<1x1xf32, #tpu.memory_space<vmem>>, vector<1x1xf32>
      %326 = vector.shape_cast %325 : vector<1x1xf32> to vector<1xf32>
      %327 = vector.shape_cast %326 : vector<1xf32> to vector<1x1xf32>
      %328 = arith.addf %324, %327 : vector<1x1xf32>
      %c0_120 = arith.constant 0 : index
      %c0_121 = arith.constant 0 : index
      %c0_122 = arith.constant 0 : index
      %329 = vector.load %arg22[%c0_120, %c0_121, %c0_122] : memref<1x1x1xf32, #tpu.memory_space<vmem>>, vector<1x1x1xf32>
      %330 = vector.shape_cast %329 : vector<1x1x1xf32> to vector<1x1xf32>
      %331 = vector.shape_cast %328 : vector<1x1xf32> to vector<1x1x1xf32>
      tpu.vector_store %arg22[%c0_120, %c0_121, %c0_122], %331 {strides = array<i32>} : memref<1x1x1xf32, #tpu.memory_space<vmem>>, vector<1x1x1xf32>,
    } else {
    }
    return
  }
  func.func @transform_0(%arg0: i32, %arg1: i32) -> (i32, i32, i32) {
    %c0_i32 = arith.constant 0 : i32
    %c0_i32_0 = arith.constant 0 : i32
    %c0_i32_1 = arith.constant 0 : i32
    return %arg0, %c0_i32, %c0_i32_0 : i32, i32, i32
  }
  func.func @transform_1(%arg0: i32, %arg1: i32) -> (i32, i32, i32) {
    %c0_i32 = arith.constant 0 : i32
    %c0_i32_0 = arith.constant 0 : i32
    %c0_i32_1 = arith.constant 0 : i32
    return %arg1, %c0_i32, %c0_i32_0 : i32, i32, i32
  }
  func.func @transform_2(%arg0: i32, %arg1: i32) -> (i32, i32, i32) {
    %c0_i32 = arith.constant 0 : i32
    %c0_i32_0 = arith.constant 0 : i32
    %c0_i32_1 = arith.constant 0 : i32
    return %arg1, %c0_i32, %c0_i32_0 : i32, i32, i32
  }
  func.func @transform_3(%arg0: i32, %arg1: i32) -> (i32, i32, i32) {
    %c0_i32 = arith.constant 0 : i32
    %c0_i32_0 = arith.constant 0 : i32
    %c0_i32_1 = arith.constant 0 : i32
    return %arg1, %c0_i32, %c0_i32_0 : i32, i32, i32
  }
  func.func @transform_4(%arg0: i32, %arg1: i32) -> (i32, i32, i32) {
    %c0_i32 = arith.constant 0 : i32
    %c0_i32_0 = arith.constant 0 : i32
    %c0_i32_1 = arith.constant 0 : i32
    return %arg1, %c0_i32, %c0_i32_0 : i32, i32, i32
  }
  func.func @transform_5(%arg0: i32, %arg1: i32) -> (i32, i32, i32) {
    %c0_i32 = arith.constant 0 : i32
    %c0_i32_0 = arith.constant 0 : i32
    %c0_i32_1 = arith.constant 0 : i32
    return %arg1, %c0_i32, %c0_i32_0 : i32, i32, i32
  }
  func.func @transform_6(%arg0: i32, %arg1: i32) -> (i32, i32, i32) {
    %c0_i32 = arith.constant 0 : i32
    %c0_i32_0 = arith.constant 0 : i32
    %c0_i32_1 = arith.constant 0 : i32
    return %arg1, %c0_i32, %c0_i32_0 : i32, i32, i32
  }
  func.func @transform_7(%arg0: i32, %arg1: i32) -> (i32, i32, i32) {
    %c0_i32 = arith.constant 0 : i32
    %c0_i32_0 = arith.constant 0 : i32
    %c0_i32_1 = arith.constant 0 : i32
    return %arg1, %c0_i32, %c0_i32_0 : i32, i32, i32
  }
  func.func @transform_8(%arg0: i32, %arg1: i32) -> (i32, i32, i32) {
    %c0_i32 = arith.constant 0 : i32
    %c0_i32_0 = arith.constant 0 : i32
    %c0_i32_1 = arith.constant 0 : i32
    return %arg1, %c0_i32, %c0_i32_0 : i32, i32, i32
  }
  func.func @transform_9(%arg0: i32, %arg1: i32) -> (i32, i32, i32) {
    %c0_i32 = arith.constant 0 : i32
    %c0_i32_0 = arith.constant 0 : i32
    %c0_i32_1 = arith.constant 0 : i32
    return %arg1, %c0_i32, %c0_i32_0 : i32, i32, i32
  }
  func.func @transform_10(%arg0: i32, %arg1: i32) -> (i32, i32, i32) {
    %c0_i32 = arith.constant 0 : i32
    %c0_i32_0 = arith.constant 0 : i32
    %c0_i32_1 = arith.constant 0 : i32
    return %arg1, %c0_i32, %c0_i32_0 : i32, i32, i32
  }
  func.func @transform_11(%arg0: i32, %arg1: i32) -> (i32, i32) {
    %c0_i32 = arith.constant 0 : i32
    %c0_i32_0 = arith.constant 0 : i32
    %c0_i32_1 = arith.constant 0 : i32
    return %c0_i32, %c0_i32_0 : i32, i32
  }
  func.func @transform_12(%arg0: i32, %arg1: i32) -> (i32, i32) {
    %c0_i32 = arith.constant 0 : i32
    %c0_i32_0 = arith.constant 0 : i32
    %c0_i32_1 = arith.constant 0 : i32
    return %c0_i32, %c0_i32_0 : i32, i32
  }
  func.func @transform_13(%arg0: i32, %arg1: i32) -> (i32, i32, i32) {
    %c0_i32 = arith.constant 0 : i32
    %c0_i32_0 = arith.constant 0 : i32
    %c0_i32_1 = arith.constant 0 : i32
    return %arg0, %c0_i32, %c0_i32_0 : i32, i32, i32
  }
  func.func @transform_14(%arg0: i32, %arg1: i32) -> (i32, i32) {
    %c0_i32 = arith.constant 0 : i32
    %c0_i32_0 = arith.constant 0 : i32
    %c0_i32_1 = arith.constant 0 : i32
    return %c0_i32, %c0_i32_0 : i32, i32
  }
  func.func @transform_15(%arg0: i32, %arg1: i32) -> (i32, i32) {
    %c0_i32 = arith.constant 0 : i32
    %c0_i32_0 = arith.constant 0 : i32
    %c0_i32_1 = arith.constant 0 : i32
    return %c0_i32, %c0_i32_0 : i32, i32
  }
  func.func @transform_16(%arg0: i32, %arg1: i32) -> (i32, i32) {
    %c0_i32 = arith.constant 0 : i32
    %c0_i32_0 = arith.constant 0 : i32
    %c0_i32_1 = arith.constant 0 : i32
    return %c0_i32, %c0_i32_0 : i32, i32
  }
  func.func @transform_17(%arg0: i32, %arg1: i32) -> (i32, i32) {
    %c0_i32 = arith.constant 0 : i32
    %c0_i32_0 = arith.constant 0 : i32
    %c0_i32_1 = arith.constant 0 : i32
    return %c0_i32, %c0_i32_0 : i32, i32
  }
  func.func @transform_18(%arg0: i32, %arg1: i32) -> (i32, i32) {
    %c0_i32 = arith.constant 0 : i32
    %c0_i32_0 = arith.constant 0 : i32
    %c0_i32_1 = arith.constant 0 : i32
    return %c0_i32, %c0_i32_0 : i32, i32
  }
  func.func @transform_19(%arg0: i32, %arg1: i32) -> (i32, i32) {
    %c0_i32 = arith.constant 0 : i32
    %c0_i32_0 = arith.constant 0 : i32
    %c0_i32_1 = arith.constant 0 : i32
    return %c0_i32, %c0_i32_0 : i32, i32
  }
  func.func @transform_20(%arg0: i32, %arg1: i32) -> (i32, i32, i32) {
    %c0_i32 = arith.constant 0 : i32
    %c0_i32_0 = arith.constant 0 : i32
    %c0_i32_1 = arith.constant 0 : i32
    return %arg0, %c0_i32, %c0_i32_0 : i32, i32, i32
  }
}

</mosaic_0001>

<bundles_post_ra>
// kernel: tpu_custom_call.1
= control target key start
LH: loop header
LB: loop body
LE: loop exit
PB: predicated region body
PF: predicated region fallthrough
CT: control target
= control target key end

     0   :  { %s2748_s23 = smov 0   ;;  %s2750_s24 = smov 0   ;;  %s3202_s0 = inlined_call_operand.vmem [shape: f32[2,8,32], index: 0, kind: input, shape index: {}]   ;;  %s3203_s1 = inlined_call_operand.vmem [shape: f32[2,1,32], index: 1, kind: input, shape index: {}]   ;;  %s3204_s2 = inlined_call_operand.vmem [shape: bf16[2,32,128], index: 2, kind: input, shape index: {}]   ;;  %s3205_s3 = inlined_call_operand.vmem [shape: f32[2,4,64], index: 3, kind: input, shape index: {}]   ;;  %s3206_s4 = inlined_call_operand.vmem [shape: f32[2,1,64], index: 4, kind: input, shape index: {}]   ;;  %s3207_s5 = inlined_call_operand.vmem [shape: f32[2,64,64], index: 5, kind: input, shape index: {}]   ;;  %s3208_s6 = inlined_call_operand.vmem [shape: f32[2,1,64], index: 6, kind: input, shape index: {}]   ;;  %s3209_s7 = inlined_call_operand.vmem [shape: bf16[2,64,32], index: 7, kind: input, shape index: {}]   ;;  %s3210_s8 = inlined_call_operand.vmem [shape: f32[2,16,64], index: 8, kind: input, shape index: {}]   ;;  %s3211_s9 = inlined_call_operand.vmem [shape: f32[2,1,64], index: 9, kind: input, shape index: {}]   ;;  %s3212_s10 = inlined_call_operand.vmem [shape: bf16[2,64,32], index: 10, kind: input, shape index: {}]   ;;  %s3213_s11 = inlined_call_operand.vmem [shape: f32[1,32], index: 11, kind: input, shape index: {}]   ;;  %s3214_s12 = inlined_call_operand.vmem [shape: f32[1,32], index: 12, kind: input, shape index: {}]   ;;  %s3215_s13 = inlined_call_operand.vmem [shape: f32[2,1,7], index: 13, kind: input, shape index: {}]   ;;  %s3216_s14 = inlined_call_operand.vmem [shape: f32[8,64], index: 14, kind: input, shape index: {}]   ;;  %s3217_s15 = inlined_call_operand.vmem [shape: f32[1,64], index: 15, kind: input, shape index: {}]   ;;  %s3218_s16 = inlined_call_operand.vmem [shape: f32[64,32], index: 16, kind: input, shape index: {}]   ;;  %s3219_s17 = inlined_call_operand.vmem [shape: f32[1,32], index: 17, kind: input, shape index: {}]   ;;  %s3220_s18 = inlined_call_operand.vmem [shape: f32[32,1], index: 18, kind: input, shape index: {}]   ;;  %s3221_s19 = inlined_call_operand.<no memory space> [shape: f32[1,1], index: 19, kind: input, shape index: {}]   ;;  %s3222_s20 = inlined_call_operand.vmem [shape: f32[2,1,1], index: 20, kind: output, shape index: {}]  }
   0x1   :  { %3229 = sst [smem:[#allocation15_spill]] %s3202_s0  ;;  %v25_v0 = vstv %s3221_s19  ;;  %s2754_s25 = smov 0  }
   0x2   :  { %3230 = sst [smem:[#allocation16_spill]] %s3203_s1  ;;  %26 = vst [vmem:[#allocation8] sm:$0x1] %v25_v0 }
   0x3   :  { %3231 = sst [smem:[#allocation17_spill]] %s3204_s2  ;;  %s2752_s2 = smov 0  }
   0x4   :  { %3232 = sst [smem:[#allocation18_spill]] %s3205_s3  ;;  %s2756_s3 = smov 0  }
   0x5   :  { %3233 = sst [smem:[#allocation19_spill]] %s3206_s4 }
   0x6   :  { %3234 = sst [smem:[#allocation20_spill]] %s3213_s11 }
   0x7   :  { %3235 = sst [smem:[#allocation21_spill]] %s3214_s12 }
   0x8   :  { %3236 = sst [smem:[#allocation22_spill]] %s3215_s13 }
   0x9   :  { %3237 = sst [smem:[#allocation23_spill]] %s3216_s14 }
   0xa   :  { %3238 = sst [smem:[#allocation24_spill]] %s3217_s15 }
   0xb   :  { %3239 = sst [smem:[#allocation25_spill]] %s3218_s16 }
   0xc   :  { %3240 = sst [smem:[#allocation26_spill]] %s3219_s17 }
   0xd   :  { %3241 = sst [smem:[#allocation27_spill]] %s3220_s18 }
   0xe LB: > { %3242 = sst [smem:[#allocation9_spill]] %s2614_s23  ;;  %s41_s19 = sadd.s32 1, %s2622_s2  ;;  %s2630_s3 = sphi %s2756_s3, %s32_s3   ;;  %s2626_s25 = sphi %s2754_s25, %s3272_s25   ;;  %s2622_s2 = sphi %s2752_s2, %s3271_s2   ;;  %s2618_s24 = sphi %s2750_s24, %s3270_s24   ;;  %s2614_s23 = sphi %s2748_s23, %s3269_s23  }
   0xf   : > { %3243 = sst [smem:[#allocation10_spill]] %s2622_s2  ;;  %s44_s26 = sadd.s32 1, %s2626_s25 }
  0x10   : > { %3244 = sst [smem:[#allocation11_spill]] %s2626_s25  ;;  %p42_p0 = scmp.ge.s32.totalorder %s41_s19, 2 }
  0x11   : > { %3245 = sst [smem:[#allocation12_spill]] %s2630_s3  ;;  %p2301_p1 = scmp.ge.s32.totalorder %s2630_s3, 1 }
  0x12   : > { %p674_p2 = scmp.lt.s32.totalorder %s2630_s3, 5  ;;  %s3274_s19 = smov (%p42_p0, %s41_s19), 0 }
  0x13   : > { %3246 = sst [smem:[#allocation13_spill]] %s3274_s19  ;;  %s3276_s26 = smov (!%p42_p0, %s44_s26), %s2626_s25 }
  0x14   : > { %p675_p3 = pnand %p2301_p1, %p674_p2  ;;  %p46_p4 = scmp.ge.s32.totalorder %s3276_s26, 2 }
  0x15   : > { %p773_p5 = scmp.lt.s32.totalorder (!%p675_p3), %s2618_s24, 1  ;;  %p777_p6 = scmp.lt.s32.totalorder (!%p675_p3), %s2614_s23, 1 }
  0x16   : > { %s3278_s26 = smov (%p46_p4, %s3276_s26), 0  ;;  %678 = sbr.rel (%p675_p3) target bundleno = 2105 (0x839), region = 100 }
  0x17   : > { %3247 = sst [smem:[#allocation14_spill]] %s3278_s26 }
  0x18   : > { %s3249_s1 = sld [smem:[#allocation15_spill]] (!%p675_p3) }
  0x19   : > { %s3251_s16 = sld [smem:[#allocation17_spill]] (!%p675_p3) }
  0x1a   : > { %s3253_s0 = sld [smem:[#allocation19_spill]] (!%p675_p3) }
  0x1b   : > { %s3280_s24 = smov (!%p773_p5, %s2618_s24), 1 }
  0x1c   : > { %s2784_s27 = scalar_select %p777_p6, %s2614_s23, 1 }
  0x1d   : > { %s2302_s28 = sshll.u32 %s3280_s24, 3  ;;  %s3252_s23 = sld [smem:[#allocation18_spill]] }
  0x1e   : > { %s776_s22 = scalar_lea.vmem %s3249_s1, %s2302_s28  ;;  %s2350_s3 = sshll.u32 %s2784_s27, 4 }
  0x1f   : > { %s2305_s17 = sshll.u32 %s2784_s27, 2  ;;  %s784_s14 = scalar_lea.vmem %s3251_s16, %s2350_s3 }
  0x20   : > { %s791_s21 = scalar_lea.vmem %s3253_s0, %s2784_s27  ;;  %s2351_s28 = sshll.u32 %s2784_s27, 6 }
  0x21   : > { %s2816_s25 = scalar_lea.vmem %s3207_s5, %s2351_s28  ;;  %s799_s15 = scalar_lea.vmem %s3208_s6, %s2784_s27 }
  0x22   : > { %s2352_s16 = sshll.u32 %s2784_s27, 5  ;;  %s2826_s11 = scalar_lea.vmem %s3210_s8, %s2350_s3 }
  0x23   : > { %s2806_s4 = scalar_lea.vmem %s3252_s23, %s2305_s17  ;;  %s2831_s23 = scalar_lea.vmem %s3209_s7, %s2352_s16 }
  0x24   : > { %s812_s13 = scalar_lea.vmem %s3211_s9, %s2784_s27  ;;  %s2840_s1 = scalar_lea.vmem %s3212_s10, %s2352_s16 }
  0x25   : > { %s823_s2 = scalar_lea.vmem %s3222_s20, %s3280_s24  ;;  %s3254_s3 = sld [smem:[#allocation9_spill]] }
  0x2b   : > { %p2314_p7 = scmp.ne.s32.totalorder %s3254_s3, 0 }
  0x2d   : > { %828 = sbr.rel (%p2314_p7) target bundleno = 52 (0x34), region = 104 }
  0x32   : > { %v829_v1 = vld [vmem:[%s776_s22] sm:$0xff]  ;;  %vm830_vm0 = vcmask 261120  }
  0x33   : > { %831 = vst.msk [vmem:[#allocation2] sm:$0xff] %vm830_vm0, %v829_v1 }
  0x34 PF: > { %vm834_vm1 = vcmask 261120   ;;  %v2527_v5 = vld [vmem:[%s784_s14 + $0x8] sm:$0xff]   ;;  %v2632_v6 = vmov 0.0   ;;  %vm2633_vm2 = vmmov 0   ;;  %v2528_v7 = vld [vmem:[%s784_s14] sm:$0xff]   ;;  %s3255_s16 = sld [smem:[#allocation16_spill]]  ;;  %v911_v28 = vlaneseq }
  0x35   : > { %2393 = vmatprep.subr.bf16.mxu0 %v2632_v6  ;;  %2397 = vmatprep.mubr.msk.bf16.mxu0 %vm2633_vm2, %v2632_v6  ;;  %v977_v16 = vld [vmem:[%s2816_s25 + $0x38] sm:$0xff]  ;;  %v976_v17 = vld [vmem:[%s2816_s25 + $0x30] sm:$0xff]  ;;  %v975_v19 = vld [vmem:[%s2816_s25 + $0x28] sm:$0xff]  ;;  %vm985_vm6 = vcmask 523264   ;;  %vm1153_vm7 = vcmask 130048   ;;  %vm1706_vm9 = vcmask 1040384  }
  0x36   : > { %2394 = vmatpush3.bf16.msra.mxu0 %v2527_v5  ;;  %2401 = vmatprep.subr.mxu1 %v2632_v6  ;;  %v2529_v18 = vld [vmem:[%s2831_s23 + $0x18] sm:$0xff]   ;;  %v2530_v20 = vld [vmem:[%s2831_s23 + $0x10] sm:$0xff]   ;;  %v974_v21 = vld [vmem:[%s2816_s25 + $0x20] sm:$0xff]  ;;  %v2887_v29 = vshrl.u32 %v911_v28, 7  ;;  %vm1708_vm10 = vcmask 1041408   ;;  %vm1710_vm11 = vcmask 1042432  }
  0x37   : > { %2395 = vmatprep.subr.bf16.mxu0 %v2632_v6  ;;  %2417 = vmatprep.mubr.msk.f32.mxu1 %vm2633_vm2, %v2632_v6  ;;  %v973_v22 = vld [vmem:[%s2816_s25 + $0x18] sm:$0xff]  ;;  %v2531_v23 = vld [vmem:[%s2831_s23 + $0x8] sm:$0xff]   ;;  %v972_v24 = vld [vmem:[%s2816_s25 + $0x10] sm:$0xff]  ;;  %vm1712_vm12 = vcmask 1043456   ;;  %vm1714_vm13 = vcmask 1044480   ;;  %vm1716_vm14 = vcmask 1045504  }
  0x38   : > { %2402 = vmatpush3.msra.mxu1 %v977_v16  ;;  %v971_v25 = vld [vmem:[%s2816_s25 + $0x8] sm:$0xff]  ;;  %v2532_v26 = vld [vmem:[%s2831_s23] sm:$0xff]   ;;  %vm919_vm3 = vcmp.ge.s32.totalorder %v2887_v29, 1  ;;  %vm931_vm4 = vcmp.ge.s32.totalorder %v2887_v29, 2  ;;  %vm943_vm5 = vcmp.ge.s32.totalorder %v2887_v29, 3  ;;  %s2634_s23 = smov 112  }
  0x39   : > { %2403 = vmatprep.subr.mxu1 %v2632_v6  ;;  %v970_v27 = vld [vmem:[%s2816_s25] sm:$0xff]  ;;  %vm1718_vm15 = vcmask 1046528   ;;  %s3258_s29 = sld [smem:[#allocation9_spill]] }
  0x3a   : > { %v832_v2 = vld [vmem:[#allocation2] sm:$0xff]  ;;  %2396 = vmatpush3.bf16.msra.mxu0 %v2528_v7  ;;  %s3256_s18 = scalar_lea.vmem %s3255_s16, %s2784_s27  ;;  %2404 = vmatpush3.msra.mxu1 %v976_v17  ;;  %v1339_v7 = vsub.s32 3, %v2887_v29 }
  0x3b   : > { %v833_v3 = vmul.f32 %v832_v2, %v832_v2  ;;  %2420 = vmatprep.subr.bf16.mxu0 %v2632_v6  ;;  %v2315_v12 = vld [vmem:[%s3256_s18] ss:$0 sm:$0xff]  ;;  %2405 = vmatprep.subr.mxu1 %v2632_v6  ;;  %v2319_v31 = vld [vmem:[%s2806_s4 + $0x3] ss:$0 sm:$0xff]  ;;  %v2320_v33 = vld [vmem:[%s2806_s4 + $0x2] ss:$0 sm:$0xff] }
  0x3c   : > { %2406 = vmatpush3.msra.mxu1 %v975_v19  ;;  %v2321_v39 = vld [vmem:[%s2806_s4 + $0x1] ss:$0 sm:$0xff]  ;;  %v2322_v44 = vld [vmem:[%s2806_s4] ss:$0 sm:$0xff] }
  0x3d   : > { %v835_v4 = vsel %vm834_vm1, %v833_v3, 0.0  ;;  %2407 = vmatprep.subr.mxu1 %v2632_v6  ;;  %v2323_v50 = vld [vmem:[%s791_s21] ss:$0 sm:$0xff] }
  0x3e   : > { %836 = vadd.xlane.f32.xlu0 %v835_v4  ;;  %2408 = vmatpush3.msra.mxu1 %v974_v21  ;;  %v2325_v59 = vld [vmem:[%s799_s15] ss:$0 sm:$0xff]  ;;  %v2923_v4 = vsub.s32 0, %v2887_v29  ;;  %s2635_s15 = smov 64  }
  0x3f   : > { %2409 = vmatprep.subr.mxu1 %v2632_v6  ;;  %p2339_p8 = scmp.ne.s32.totalorder %s3258_s29, 1 }
  0x40   : > { %2410 = vmatpush3.msra.mxu1 %v973_v22  ;;  %v1383_v22 = vsub.s32 7, %v2887_v29  ;;  %s3259_s0 = sld [smem:[#allocation22_spill]] (!%p2339_p8) }
  0x41   : > { %2411 = vmatprep.subr.mxu1 %v2632_v6  ;;  %s3261_s3 = sld [smem:[#allocation20_spill]] (!%p2339_p8) }
  0x42   : > { %2412 = vmatpush3.msra.mxu1 %v972_v24  ;;  %s3262_s16 = sld [smem:[#allocation21_spill]] (!%p2339_p8) }
  0x43   : > { %2413 = vmatprep.subr.mxu1 %v2632_v6  ;;  %s3263_s12 = sld [smem:[#allocation23_spill]] (!%p2339_p8) }
  0x44   : > { %2414 = vmatpush3.msra.mxu1 %v971_v25  ;;  %s3264_s21 = sld [smem:[#allocation25_spill]] (!%p2339_p8) }
  0x45   : > { %2415 = vmatprep.subr.mxu1 %v2632_v6  ;;  %s3265_s18 = sld [smem:[#allocation24_spill]] (!%p2339_p8) }
  0x46   : > { %2416 = vmatpush3.msra.mxu1 %v970_v27  ;;  %s3260_s28 = scalar_lea.vmem (!%p2339_p8), %s3259_s0, %s3280_s24  ;;  %s3266_s17 = sld [smem:[#allocation27_spill]] (!%p2339_p8) }
  0x47   : > { %2432 = vmatprep.subr.bf16.mxu1 %v2632_v6  ;;  %s3267_s0 = sld [smem:[#allocation26_spill]] (!%p2339_p8) }
  0xc7   : > { %v837_v8 = vpop.xlane.xlu0 %836 }
  0xc8   : > { %v839_v9 = vmul.f32 0.03125, %v837_v8 }
  0xca   : > { %v840_v10 = vadd.f32 1e-05, %v839_v9 }
  0xcc   : > { %2539 = vrsqrt.f32 %v840_v10 }
  0xd9   : > { %v2540_v11 = vpop.eup %2539 }
  0xda   : > { %v842_v13 = vmul.f32 %v2540_v11, %v832_v2 }
  0xdc   : > { %v850_v14 = vmul.f32 %v2315_v12, %v842_v13  ;;  %v1350_v12 = vsub.s32 4, %v2887_v29 }
  0xde   : > { %v851_v15 = vpack.c.bf16 %v850_v14, %v850_v14  ;;  %v1361_v14 = vsub.s32 5, %v2887_v29 }
  0xe0   : > { %2398 = vmatmul.mubr.msk.bf16.vlgmr.msra.gmra.mxu0 %vm834_vm1, %v851_v15  ;;  %v1317_v15 = vsub.s32 1, %v2887_v29 }
  0xe1   : > { %2428 = vmatprep.mubr.msk.bf16.mxu0 %vm2633_vm2, %v2632_v6  ;;  %2421 = vmatpush3.bf16.msra.mxu0 %v2529_v18  ;;  %v1372_v18 = vsub.s32 6, %v2887_v29 }
  0xe2   : > { %2422 = vmatprep.subr.bf16.mxu0 %v2632_v6 }
  0xe5   : > { %2423 = vmatpush3.bf16.msra.mxu0 %v2530_v20 }
  0xe6   : > { %2424 = vmatprep.subr.bf16.mxu0 %v2632_v6 }
  0xe9   : > { %2425 = vmatpush3.bf16.msra.mxu0 %v2531_v23  ;;  %v1328_v23 = vsub.s32 2, %v2887_v29 }
  0xea   : > { %2426 = vmatprep.subr.bf16.mxu0 %v2632_v6 }
  0xed   : > { %2427 = vmatpush3.bf16.msra.mxu0 %v2532_v26 }
 0x1a0   : > { %v2889_v30 = vpop.f32.mrf.mxu0 }
 0x1a1   : > { %v920_v32 = vrot.slane %v2889_v30, 7  ;;  %v932_v34 = vrot.slane %v2889_v30, 6  ;;  %v944_v35 = vrot.slane %v2889_v30, 5  ;;  %v918_v40 = vmul.f32 %v2319_v31, %v2889_v30 }
 0x1a2   : > { %v2399_v36 = vpop.f32.mrf.mxu0 }
 0x1a3   : > { %v923_v37 = vsel %vm919_vm3, %v920_v32, 0.0  ;;  %v935_v38 = vsel %vm931_vm4, %v932_v34, 0.0  ;;  %v947_v43 = vsel %vm943_vm5, %v944_v35, 0.0 }
 0x1a4   : > { %v929_v41 = vmul.f32 %v2320_v33, %v923_v37  ;;  %v908_v42 = vpop.f32.mrf.mxu0  ;;  %v941_v46 = vmul.f32 %v2321_v39, %v935_v38  ;;  %v953_v49 = vmul.f32 %v2322_v44, %v947_v43  ;;  %v2333_v39 = vmul.f32 -1.442695, %v2889_v30 }
 0x1a6   : > { %v930_v45 = vadd.f32 %v929_v41, %v918_v40  ;;  %v2400_v47 = vpop.f32.mrf.mxu0 }
 0x1a8   : > { %v942_v48 = vadd.f32 %v941_v46, %v930_v45 }
 0x1aa   : > { %v954_v51 = vadd.f32 %v953_v49, %v942_v48 }
 0x1ac   : > { %v962_v52 = vadd.f32 %v2323_v50, %v954_v51 }
 0x1ae   : > { %v2324_v53 = vmul.f32 -1.442695, %v962_v52 }
 0x1b0   : > { %2541 = vpow2.f32 %v2324_v53  ;;  %v2636_v53 = vmov 1966171168  }
 0x1bd   : > { %v2542_v54 = vpop.eup %2541 }
 0x1be   : > { %v966_v55 = vadd.f32 1.0, %v2542_v54  ;;  %v1169_v54 = vunpack.c.l.s4 %v2636_v53 }
 0x1c0   : > { %2543 = vrcp.f32 %v966_v55  ;;  %v1170_v55 = vunpack.c.0.s8 %v1169_v54 }
 0x1cd   : > { %v2544_v56 = vpop.eup %2543 }
 0x1ce   : > { %v2907_v57 = vmul.f32 %v2544_v56, %v962_v52  ;;  %v2535_v56 = vld [vmem:[%s2840_s1 + $0x18] sm:$0xff]  }
 0x1d0   : > { %2418 = vmatmul.mubr.msk.f32.vlgmr.msra.gmra.mxu1 %vm985_vm6, %v2907_v57  ;;  %v1074_v58 = vpack.c.bf16 %v2907_v57, %v2907_v57 }
 0x1d1   : > { %2440 = vmatprep.mubr.msk.bf16.mxu1 %vm2633_vm2, %v2632_v6  ;;  %2433 = vmatpush3.bf16.msra.mxu1 %v2535_v56 }
 0x1d2   : > { %2429 = vmatmul.mubr.msk.bf16.vlgmr.msra.gmra.mxu0 %vm985_vm6, %v1074_v58  ;;  %v2536_v58 = vld [vmem:[%s2840_s1 + $0x10] sm:$0xff]   ;;  %2434 = vmatprep.subr.bf16.mxu1 %v2632_v6 }
 0x1d5   : > { %2435 = vmatpush3.bf16.msra.mxu1 %v2536_v58 }
 0x1d6   : > { %2436 = vmatprep.subr.bf16.mxu1 %v2632_v6 }
 0x290   : > { %v1055_v60 = vpop.f32.mrf.mxu1 }
 0x291   : > { %v1056_v61 = vadd.f32 %v2325_v59, %v1055_v60  ;;  %v2955_v59 = vsub.s32 %v1170_v55, %v2887_v29 }
 0x292   : > { %v2419_v62 = vpop.f32.mrf.mxu1  ;;  %v1144_v63 = vpop.f32.mrf.mxu0 }
 0x293   : > { %v1060_v0 = vand.u32 2147483647, %v1056_v61  ;;  %1154 = vst.msk [vmem:[#allocation5] sm:$0xff] %vm1153_vm7, %v1144_v63  ;;  %1156 = vrot.lane.b32.xlu0 %v1144_v63, %s2634_s23  ;;  %v1059_v34 = vmax.f32 %v1056_v61, 0.0  ;;  %v2537_v61 = vld [vmem:[%s2840_s1 + $0x8] sm:$0xff]   ;;  %v2538_v63 = vld [vmem:[%s2840_s1] sm:$0xff]  }
 0x294   : > { %v2430_v1 = vpop.f32.mrf.mxu0  ;;  %2437 = vmatpush3.bf16.msra.mxu1 %v2537_v61  ;;  %s2637_s1 = smov (!%p2339_p8), 1  }
 0x295   : > { %v1061_v2 = vsub.f32 0.0, %v1060_v0  ;;  %2438 = vmatprep.subr.bf16.mxu1 %v2632_v6 }
 0x296   : > { %v1147_v3 = vpop.f32.mrf.mxu0 }
 0x297   : > { %v1062_v5 = vmul.f32 1.442695, %v1061_v2  ;;  %v2966_v3 = vld [vmem:[%s2826_s11 + $0x8] sm:$0xff] }
 0x298   : > { %v2431_v8 = vpop.f32.mrf.mxu0  ;;  %2439 = vmatpush3.bf16.msra.mxu1 %v2538_v63 }
 0x299   : > { %2545 = vpow2.f32 %v1062_v5  ;;  %v2969_v5 = vld [vmem:[%s2826_s11] sm:$0xff] }
 0x29a   : > { %v1164_v9 = vld [vmem:[#allocation5] sm:$0xff] }
 0x29b   : > { %v1340_v10 = vrot.slane %v1164_v9, %v1339_v7  ;;  %v1307_v11 = vrot.slane %v1164_v9, %v2923_v4  ;;  %v1351_v13 = vrot.slane %v1164_v9, %v1350_v12  ;;  %v1362_v16 = vrot.slane %v1164_v9, %v1361_v14 }
 0x29c   : > { %v1318_v17 = vrot.slane %v1164_v9, %v1317_v15  ;;  %v1373_v21 = vrot.slane %v1164_v9, %v1372_v18  ;;  %v1384_v24 = vrot.slane %v1164_v9, %v1383_v22  ;;  %v1329_v25 = vrot.slane %v1164_v9, %v1328_v23 }
 0x29d   : > { %1346 = vbcast.lane.b32.xlu0 %v1340_v10, 264  ;;  %1309 = vbcast.lane.b32.xlu1 %v1307_v11, 256 }
 0x2a1   : > { %1357 = vbcast.lane.b32.xlu0 %v1351_v13, 264  ;;  %1313 = vbcast.lane.b32.xlu1 %v1307_v11, 264 }
 0x2a5   : > { %1368 = vbcast.lane.b32.xlu0 %v1362_v16, 264  ;;  %1320 = vbcast.lane.b32.xlu1 %v1318_v17, 256 }
 0x2a6   : > { %v2546_v19 = vpop.eup %2545 }
 0x2a7   : > { %v1064_v20 = vadd.f32 1.0, %v2546_v19  ;;  %v1067_v26 = vmul.f32 -0.5, %v2546_v19  ;;  %v1070_v28 = vand.u32 2147483647, %v2546_v19 }
 0x2a9   : > { %2547 = vlog2.f32 %v1064_v20  ;;  %1379 = vbcast.lane.b32.xlu0 %v1373_v21, 264  ;;  %1324 = vbcast.lane.b32.xlu1 %v1318_v17, 264  ;;  %v1068_v27 = vadd.f32 1.0, %v1067_v26  ;;  %vm1071_vm8 = vcmp.lt.f32.partialorder %v1070_v28, 0.0004427343 }
 0x2aa   : > { %2549 = vpow2.f32 %v2333_v39 }
 0x2ab   : > { %v1069_v33 = vmul.f32 %v2546_v19, %v1068_v27 }
 0x2ad   : > { %1390 = vbcast.lane.b32.xlu0 %v1384_v24, 264  ;;  %1331 = vbcast.lane.b32.xlu1 %v1329_v25, 256 }
 0x2b1   : > { %1335 = vbcast.lane.b32.xlu1 %v1329_v25, 264 }
 0x2b5   : > { %1342 = vbcast.lane.b32.xlu1 %v1340_v10, 256 }
 0x2b6   : > { %v2548_v31 = vpop.eup %2547 }
 0x2b7   : > { %v1066_v32 = vmul.f32 0.6931472, %v2548_v31  ;;  %v2550_v44 = vpop.eup %2549 }
 0x2b8   : > { %v1734_v45 = vadd.f32 1.0, %v2550_v44 }
 0x2b9   : > { %v1072_v35 = vsel %vm1071_vm8, %v1069_v33, %v1066_v32  ;;  %1353 = vbcast.lane.b32.xlu1 %v1351_v13, 256 }
 0x2ba   : > { %v1073_v36 = vadd.f32 %v1072_v35, %v1059_v34  ;;  %2551 = vrcp.f32 %v1734_v45 }
 0x2bc   : > { %1150 = vst.msk [vmem:[#allocation3] sm:$0xff] %vm985_vm6, %v1073_v36  ;;  %v1151_v37 = vmul.f32 %v1073_v36, %v2907_v57 }
 0x2bd   : > { %1364 = vbcast.lane.b32.xlu1 %v1362_v16, 256 }
 0x2be   : > { %1152 = vst.msk [vmem:[#allocation4] sm:$0xff] %vm985_vm6, %v1151_v37 }
 0x2c1   : > { %1375 = vbcast.lane.b32.xlu1 %v1373_v21, 256 }
 0x2c3   : > { %v1162_v60 = vld [vmem:[#allocation3] sm:$0xff] }
 0x2c4   : > { %v1174_v62 = vrot.slane %v1162_v60, %v2955_v59  ;;  %v1167_v19 = vcombine.high %v1162_v60, %v1162_v60 }
 0x2c5   : > { %1386 = vbcast.lane.b32.xlu1 %v1384_v24, 256  ;;  %v2976_v16 = vld [vmem:[#allocation4] sm:$0xff] }
 0x2c6   : > { %v1190_v0 = vrot.slane %v1174_v62, %v2955_v59  ;;  %v1182_v1 = vcombine.high %v1174_v62, %v1174_v62  ;;  %v1400_v20 = vrot.slane %v2976_v16, %v2955_v59  ;;  %v1181_v26 = vrot.slane %v1167_v19, %v2955_v59 }
 0x2c7   : > { %v2552_v51 = vpop.eup %2551 }
 0x2c8   : > { %v1737_v52 = vmul.f32 %v2552_v51, %v2889_v30  ;;  %v1219_v2 = vrot.slane %v1190_v0, %v2923_v4  ;;  %v1204_v8 = vrot.slane %v1182_v1, %v2955_v59  ;;  %v1212_v13 = vcombine.high %v1190_v0, %v1190_v0 }
 0x2c9   : > { %v1416_v27 = vrot.slane %v1400_v20, %v2955_v59  ;;  %v1408_v32 = vcombine.high %v1400_v20, %v1400_v20  ;;  %v2990_v35 = vrot.slane %v1181_v26, %v2955_v59  ;;  %v1183_v44 = vcombine.high %v1181_v26, %v1181_v26 }
 0x2ca   : > { %v1257_v9 = vmul.f32 %v1219_v2, %v2966_v3  ;;  %v1256_v10 = vmul.f32 %v1219_v2, %v2969_v5  ;;  %v1223_v11 = vrot.slane %v1204_v8, %v2923_v4  ;;  %v1227_v17 = vrot.slane %v1212_v13, %v2923_v4 }
 0x2cb   : > { %v1445_v36 = vrot.slane %v1416_v27, %v2923_v4  ;;  %v1235_v45 = vrot.slane %v2990_v35, %v2923_v4  ;;  %v1438_v55 = vcombine.high %v1416_v27, %v1416_v27  ;;  %v1211_v56 = vrot.slane %v1183_v44, %v2955_v59 }
 0x2cc   : > { %v1261_v24 = vmul.f32 %v1227_v17, %v2966_v3  ;;  %v1260_v28 = vmul.f32 %v1227_v17, %v2969_v5  ;;  %v1393_v13 = vcombine.high %v2976_v16, %v2976_v16 }
 0x2cd   : > { %v1265_v58 = vmul.f32 %v1235_v45, %v2966_v3 }
 0x2ce   : > { %v1282_v34 = vmul.f32 1.442695, %v1261_v24  ;;  %v1280_v37 = vmul.f32 1.442695, %v1260_v28  ;;  %v1407_v28 = vrot.slane %v1393_v13, %v2955_v59 }
 0x305   : > { %v1157_v38 = vpop.permute.xlu0 %1156 }
 0x306   : > { %1159 = vst.msk [vmem:[#allocation6] sm:$0xff] %vm1153_vm7, %v1157_v38 }
 0x30d   : > { %v1165_v40 = vld [vmem:[#allocation6] sm:$0xff] }
 0x30e   : > { %v1505_v41 = vrot.slane %v1165_v40, %v2923_v4  ;;  %v1531_v42 = vrot.slane %v1165_v40, %v1317_v15  ;;  %v1557_v43 = vrot.slane %v1165_v40, %v1328_v23  ;;  %v1583_v46 = vrot.slane %v1165_v40, %v1339_v7 }
 0x30f   : > { %v1609_v47 = vrot.slane %v1165_v40, %v1350_v12  ;;  %v1635_v48 = vrot.slane %v1165_v40, %v1361_v14  ;;  %v1661_v49 = vrot.slane %v1165_v40, %v1372_v18  ;;  %v1687_v50 = vrot.slane %v1165_v40, %v1383_v22  ;;  %v1310_v30 = vpop.permute.xlu1 %1309 }
 0x310   : > { %1511 = vbcast.lane.b32.xlu0 %v1505_v41, 264  ;;  %1507 = vbcast.lane.b32.xlu1 %v1505_v41, 256  ;;  %v1274_v12 = vmul.f32 1.442695, %v1257_v9  ;;  %v1272_v14 = vmul.f32 1.442695, %v1256_v10  ;;  %v1259_v15 = vmul.f32 %v1223_v11, %v2966_v3  ;;  %v1258_v18 = vmul.f32 %v1223_v11, %v2969_v5 }
 0x311   : > { %v1214_v22 = vcombine.high %v1204_v8, %v1204_v8  ;;  %v1430_v40 = vrot.slane %v1408_v32, %v2955_v59  ;;  %v1290_v8 = vmul.f32 1.442695, %v1265_v58  ;;  %v1239_v9 = vrot.slane %v1211_v56, %v2923_v4 }
 0x312   : > { %2553 = vpow2.f32 %v1274_v12  ;;  %v1278_v23 = vmul.f32 1.442695, %v1259_v15  ;;  %v1276_v25 = vmul.f32 1.442695, %v1258_v18  ;;  %v1453_v10 = vrot.slane %v1438_v55, %v2923_v4 }
 0x313   : > { %v1314_v29 = vpop.permute.xlu1 %1313  ;;  %2555 = vpow2.f32 %v1272_v14  ;;  %v1231_v31 = vrot.slane %v1214_v22, %v2923_v4  ;;  %v1449_v51 = vrot.slane %v1430_v40, %v2923_v4  ;;  %v1440_v17 = vcombine.high %v1430_v40, %v1430_v40 }
 0x314   : > { %1537 = vbcast.lane.b32.xlu0 %v1531_v42, 264  ;;  %1533 = vbcast.lane.b32.xlu1 %v1531_v42, 256  ;;  %2557 = vpow2.f32 %v1278_v23  ;;  %v1483_v41 = vmul.f32 %v1445_v36, %v1314_v29  ;;  %v1213_v18 = vcombine.high %v2990_v35, %v2990_v35  ;;  %v1267_v19 = vmul.f32 %v1239_v9, %v2966_v3 }
 0x315   : > { %2559 = vpow2.f32 %v1276_v25  ;;  %v1263_v38 = vmul.f32 %v1231_v31, %v2966_v3  ;;  %v1262_v42 = vmul.f32 %v1231_v31, %v2969_v5  ;;  %v1266_v16 = vmul.f32 %v1239_v9, %v2969_v5 }
 0x316   : > { %2561 = vpow2.f32 %v1282_v34  ;;  %v1294_v31 = vmul.f32 1.442695, %v1267_v19  ;;  %v1457_v32 = vrot.slane %v1440_v17, %v2923_v4 }
 0x317   : > { %v1321_v7 = vpop.permute.xlu1 %1320  ;;  %2563 = vpow2.f32 %v1280_v37  ;;  %v1284_v54 = vmul.f32 1.442695, %v1262_v42  ;;  %v1292_v34 = vmul.f32 1.442695, %v1266_v16  ;;  %v1215_v42 = vcombine.high %v1211_v56, %v1211_v56 }
 0x318   : > { %1563 = vbcast.lane.b32.xlu0 %v1557_v43, 264  ;;  %1559 = vbcast.lane.b32.xlu1 %v1557_v43, 256  ;;  %v1484_v0 = vmul.f32 %v1449_v51, %v1321_v7 }
 0x31b   : > { %v1325_v6 = vpop.permute.xlu1 %1324 }
 0x31c   : > { %1589 = vbcast.lane.b32.xlu0 %v1583_v46, 264  ;;  %1585 = vbcast.lane.b32.xlu1 %v1583_v46, 256  ;;  %v1347_v46 = vpop.permute.xlu0 %1346  ;;  %v1485_v60 = vmul.f32 %v1449_v51, %v1325_v6 }
 0x31f   : > { %v2982_v21 = vpop.permute.xlu1 %1331  ;;  %v2554_v39 = vpop.eup %2553 }
 0x320   : > { %1615 = vbcast.lane.b32.xlu0 %v1609_v47, 264  ;;  %1611 = vbcast.lane.b32.xlu1 %v1609_v47, 256  ;;  %v2556_v43 = vpop.eup %2555  ;;  %v1482_v47 = vmul.f32 %v1445_v36, %v1310_v30  ;;  %v1264_v30 = vmul.f32 %v1235_v45, %v2969_v5  ;;  %v3006_v63 = vpop.permute.xlu0 %1357  ;;  %v1486_v22 = vmul.f32 %v1453_v10, %v2982_v21 }
 0x321   : > { %v1498_v53 = vmul.f32 0.0, %v2556_v43  ;;  %v2558_v62 = vpop.eup %2557  ;;  %v1243_v21 = vrot.slane %v1213_v18, %v2923_v4  ;;  %v1489_v43 = vmul.f32 %v1457_v32, %v1347_v46 }
 0x322   : > { %v2560_v2 = vpop.eup %2559  ;;  %v1288_v6 = vmul.f32 1.442695, %v1264_v30 }
 0x323   : > { %v1336_v33 = vpop.permute.xlu1 %1335  ;;  %v3003_v61 = vadd.f32 %v1498_v53, %v1482_v47  ;;  %v2562_v15 = vpop.eup %2561  ;;  %v1269_v45 = vmul.f32 %v1243_v21, %v2966_v3  ;;  %v1268_v47 = vmul.f32 %v1243_v21, %v2969_v5 }
 0x324   : > { %1641 = vbcast.lane.b32.xlu0 %v1635_v48, 264  ;;  %1637 = vbcast.lane.b32.xlu1 %v1635_v48, 256  ;;  %v1487_v14 = vmul.f32 %v1453_v10, %v1336_v33  ;;  %v3021_v20 = vpop.permute.xlu0 %1368  ;;  %v2564_v25 = vpop.eup %2563 }
 0x325   : > { %v1524_v12 = vmul.f32 %v2560_v2, %v3003_v61  ;;  %v1298_v46 = vmul.f32 1.442695, %v1269_v45 }
 0x327   : > { %v1343_v48 = vpop.permute.xlu1 %1342  ;;  %v3016_v7 = vadd.f32 %v1524_v12, %v1484_v0 }
 0x328   : > { %1667 = vbcast.lane.b32.xlu0 %v1661_v49, 264  ;;  %1663 = vbcast.lane.b32.xlu1 %v1661_v49, 256  ;;  %v1499_v49 = vmul.f32 0.0, %v2554_v39  ;;  %v3034_v36 = vpop.permute.xlu0 %1379  ;;  %v1488_v37 = vmul.f32 %v1457_v32, %v1343_v48 }
 0x329   : > { %v1550_v27 = vmul.f32 %v2564_v25, %v3016_v7 }
 0x32b   : > { %v1354_v29 = vpop.permute.xlu1 %1353  ;;  %v3031_v33 = vadd.f32 %v1550_v27, %v1486_v22 }
 0x32c   : > { %1693 = vbcast.lane.b32.xlu0 %v1687_v50, 264  ;;  %1689 = vbcast.lane.b32.xlu1 %v1687_v50, 256  ;;  %v1286_v50 = vmul.f32 1.442695, %v1263_v38  ;;  %v3048_v55 = vpop.permute.xlu0 %1390 }
 0x32e   : > { %2565 = vpow2.f32 %v1286_v50  ;;  %v1247_v50 = vrot.slane %v1215_v42, %v2923_v4 }
 0x32f   : > { %2567 = vpow2.f32 %v1284_v54  ;;  %v1365_v23 = vpop.permute.xlu1 %1364  ;;  %v1409_v54 = vcombine.high %v1407_v28, %v1407_v28 }
 0x330   : > { %1739 = vrot.lane.b32.xlu1 %v1737_v52, %s2635_s15  ;;  %v2999_v52 = vadd.f32 %v1499_v49, %v1483_v41  ;;  %2569 = vpow2.f32 %v1290_v8  ;;  %v3040_v41 = vrot.slane %v1407_v28, %v2955_v59  ;;  %v1270_v12 = vmul.f32 %v1247_v50, %v2969_v5 }
 0x331   : > { %2571 = vpow2.f32 %v1288_v6  ;;  %v3055_v8 = vrot.slane %v1409_v54, %v2955_v59 }
 0x332   : > { %v1525_v1 = vmul.f32 %v2558_v62, %v2999_v52  ;;  %2573 = vpow2.f32 %v1294_v31  ;;  %v1461_v53 = vrot.slane %v3040_v41, %v2923_v4  ;;  %v1300_v18 = vmul.f32 1.442695, %v1270_v12 }
 0x333   : > { %v3036_v38 = vpop.permute.xlu1 %1375  ;;  %2575 = vpow2.f32 %v1292_v34  ;;  %v1439_v28 = vcombine.high %v3040_v41, %v3040_v41 }
 0x334   : > { %v3011_v11 = vadd.f32 %v1525_v1, %v1485_v60  ;;  %v1296_v60 = vmul.f32 1.442695, %v1268_v47  ;;  %v1490_v30 = vmul.f32 %v1461_v53, %v1354_v29  ;;  %v1271_v1 = vmul.f32 %v1247_v50, %v2966_v3 }
 0x335   : > { %v1491_v2 = vmul.f32 %v1461_v53, %v3006_v63  ;;  %2577 = vpow2.f32 %v1298_v46  ;;  %v1465_v29 = vrot.slane %v3055_v8, %v2923_v4 }
 0x336   : > { %v1551_v24 = vmul.f32 %v2562_v15, %v3011_v11  ;;  %2579 = vpow2.f32 %v1296_v60 }
 0x337   : > { %v3050_v56 = vpop.permute.xlu1 %1386  ;;  %v1492_v22 = vmul.f32 %v1465_v29, %v1365_v23  ;;  %v1493_v27 = vmul.f32 %v1465_v29, %v3021_v20 }
 0x338   : > { %v3026_v26 = vadd.f32 %v1551_v24, %v1487_v14  ;;  %v1302_v14 = vmul.f32 1.442695, %v1271_v1 }
 0x33a   : > { %2581 = vpow2.f32 %v1302_v14 }
 0x33b   : > { %v2566_v35 = vpop.eup %2565  ;;  %2583 = vpow2.f32 %v1300_v18 }
 0x33c   : > { %v1577_v39 = vmul.f32 %v2566_v35, %v3026_v26  ;;  %v2568_v40 = vpop.eup %2567 }
 0x33d   : > { %v1576_v44 = vmul.f32 %v2568_v40, %v3031_v33  ;;  %v2570_v51 = vpop.eup %2569 }
 0x33e   : > { %v1579_v49 = vadd.f32 %v1577_v39, %v1489_v43  ;;  %v2572_v58 = vpop.eup %2571  ;;  %v1469_v43 = vrot.slane %v1439_v28, %v2923_v4 }
 0x33f   : > { %v1578_v48 = vadd.f32 %v1576_v44, %v1488_v37  ;;  %v2574_v15 = vpop.eup %2573 }
 0x340   : > { %v1603_v62 = vmul.f32 %v2570_v51, %v1579_v49  ;;  %v2576_v63 = vpop.eup %2575  ;;  %v1494_v51 = vmul.f32 %v1469_v43, %v3036_v38 }
 0x341   : > { %v1602_v0 = vmul.f32 %v2572_v58, %v1578_v48  ;;  %v1495_v58 = vmul.f32 %v1469_v43, %v3034_v36 }
 0x342   : > { %v1605_v6 = vadd.f32 %v1603_v62, %v1491_v2  ;;  %v2578_v42 = vpop.eup %2577 }
 0x343   : > { %v1604_v13 = vadd.f32 %v1602_v0, %v1490_v30 }
 0x344   : > { %v1629_v24 = vmul.f32 %v2574_v15, %v1605_v6 }
 0x345   : > { %v1628_v16 = vmul.f32 %v2576_v63, %v1604_v13 }
 0x347   : > { %v1630_v21 = vadd.f32 %v1628_v16, %v1492_v22 }
 0x382   : > { %v1512_v9 = vpop.permute.xlu0 %1511  ;;  %v1508_v10 = vpop.permute.xlu1 %1507 }
 0x383   : > { %v1514_v5 = vmul.f32 %v1512_v9, %v2999_v52  ;;  %v1513_v25 = vmul.f32 %v1508_v10, %v3003_v61  ;;  %v1631_v52 = vadd.f32 %v1629_v24, %v1493_v27 }
 0x385   : > { %v1516_v61 = vsel %vm985_vm6, %v1514_v5, 0.0  ;;  %v1515_v20 = vsel %vm985_vm6, %v1513_v25, 0.0  ;;  %v1655_v50 = vmul.f32 %v2578_v42, %v1631_v52 }
 0x386   : > { %v1538_v17 = vpop.permute.xlu0 %1537  ;;  %v1534_v3 = vpop.permute.xlu1 %1533  ;;  %v1517_v47 = vadd.f32 %v1516_v61, %v1515_v20 }
 0x387   : > { %v1540_v59 = vmul.f32 %v1538_v17, %v3011_v11  ;;  %v1539_v19 = vmul.f32 %v1534_v3, %v3016_v7  ;;  %v1657_v38 = vadd.f32 %v1655_v50, %v1495_v58 }
 0x388   : > { %v1518_v9 = vrot.slane %v1517_v47, 4 }
 0x389   : > { %v1542_v11 = vsel %vm985_vm6, %v1540_v59, 0.0  ;;  %v1541_v7 = vsel %vm985_vm6, %v1539_v19, 0.0 }
 0x38a   : > { %v1564_v31 = vpop.permute.xlu0 %1563  ;;  %v1560_v32 = vpop.permute.xlu1 %1559  ;;  %v1543_v39 = vadd.f32 %v1542_v11, %v1541_v7 }
 0x38b   : > { %v1566_v23 = vmul.f32 %v1564_v31, %v3026_v26  ;;  %v1565_v34 = vmul.f32 %v1560_v32, %v3031_v33  ;;  %v2580_v33 = vpop.eup %2579 }
 0x38c   : > { %v1654_v46 = vmul.f32 %v2580_v33, %v1630_v21  ;;  %v1544_v60 = vrot.slane %v1543_v39, 4  ;;  %v2582_v29 = vpop.eup %2581 }
 0x38d   : > { %v1568_v35 = vsel %vm985_vm6, %v1566_v23, 0.0  ;;  %v1567_v37 = vsel %vm985_vm6, %v1565_v34, 0.0  ;;  %v2584_v63 = vpop.eup %2583  ;;  %v1681_v16 = vmul.f32 %v2582_v29, %v1657_v38 }
 0x38e   : > { %v1590_v40 = vpop.permute.xlu0 %1589  ;;  %v1586_v41 = vpop.permute.xlu1 %1585  ;;  %v1569_v44 = vadd.f32 %v1568_v35, %v1567_v37  ;;  %v1656_v15 = vadd.f32 %v1654_v46, %v1494_v51  ;;  %v1545_v36 = vadd.f32 %v1544_v60, %v1543_v39 }
 0x38f   : > { %v1592_v26 = vmul.f32 %v1590_v40, %v1579_v49  ;;  %v1591_v45 = vmul.f32 %v1586_v41, %v1578_v48  ;;  %v1441_v49 = vcombine.high %v3055_v8, %v3055_v8 }
 0x390   : > { %v1570_v48 = vrot.slane %v1569_v44, 4  ;;  %v1680_v28 = vmul.f32 %v2584_v63, %v1656_v15  ;;  %v1546_v32 = vrot.slane %v1545_v36, 2 }
 0x391   : > { %v1594_v53 = vsel %vm985_vm6, %v1592_v26, 0.0  ;;  %v1593_v54 = vsel %vm985_vm6, %v1591_v45, 0.0  ;;  %v1473_v59 = vrot.slane %v1441_v49, %v2923_v4 }
 0x392   : > { %v1595_v30 = vadd.f32 %v1594_v53, %v1593_v54  ;;  %v1616_v62 = vpop.permute.xlu0 %1615  ;;  %v1612_v0 = vpop.permute.xlu1 %1611  ;;  %v1571_v8 = vadd.f32 %v1570_v48, %v1569_v44  ;;  %v1547_v42 = vadd.f32 %v1546_v32, %v1545_v36  ;;  %v2332_v32 = vld [vmem:[%s812_s13] ss:$0 sm:$0xff] }
 0x393   : > { %v1618_v1 = vmul.f32 %v1616_v62, %v1605_v6  ;;  %v1617_v2 = vmul.f32 %v1612_v0, %v1604_v13  ;;  %v1519_v13 = vadd.f32 %v1518_v9, %v1517_v47  ;;  %v1496_v5 = vmul.f32 %v1473_v59, %v3050_v56 }
 0x394   : > { %v1596_v10 = vrot.slane %v1595_v30, 4  ;;  %v1497_v31 = vmul.f32 %v1473_v59, %v3048_v55  ;;  %v1572_v34 = vrot.slane %v1571_v8, 2 }
 0x395   : > { %v1620_v12 = vsel %vm985_vm6, %v1618_v1, 0.0  ;;  %v1619_v14 = vsel %vm985_vm6, %v1617_v2, 0.0  ;;  %v1520_v61 = vrot.slane %v1519_v13, 2  ;;  %v1682_v41 = vadd.f32 %v1680_v28, %v1496_v5 }
 0x396   : > { %v1621_v17 = vadd.f32 %v1620_v12, %v1619_v14  ;;  %v1642_v3 = vpop.permute.xlu0 %1641  ;;  %v1638_v18 = vpop.permute.xlu1 %1637  ;;  %v1597_v22 = vadd.f32 %v1596_v10, %v1595_v30  ;;  %v1683_v37 = vadd.f32 %v1681_v16, %v1497_v31  ;;  %v1573_v45 = vadd.f32 %v1572_v34, %v1571_v8 }
 0x397   : > { %v1644_v19 = vmul.f32 %v1642_v3, %v1631_v52  ;;  %v1643_v6 = vmul.f32 %v1638_v18, %v1630_v21  ;;  %v1521_v50 = vadd.f32 %v1520_v61, %v1519_v13  ;;  %v1548_v30 = vrot.slane %v1547_v42, 1  ;;  %v2585_v61 = vld [vmem:[#allocation2] sm:$0xff] }
 0x398   : > { %v1622_v24 = vrot.slane %v1621_v17, 4  ;;  %v1598_v20 = vrot.slane %v1597_v22, 2  ;;  %v1574_v48 = vrot.slane %v1573_v45, 1 }
 0x399   : > { %v1646_v25 = vsel %vm985_vm6, %v1644_v19, 0.0  ;;  %v1645_v27 = vsel %vm985_vm6, %v1643_v6, 0.0  ;;  %v1522_v1 = vrot.slane %v1521_v50, 1  ;;  %v1549_v12 = vadd.f32 %v1548_v30, %v1547_v42 }
 0x39a   : > { %v1623_v11 = vadd.f32 %v1622_v24, %v1621_v17  ;;  %v1647_v7 = vadd.f32 %v1646_v25, %v1645_v27  ;;  %v1668_v4 = vpop.permute.xlu0 %1667  ;;  %v1664_v23 = vpop.permute.xlu1 %1663  ;;  %v1599_v51 = vadd.f32 %v1598_v20, %v1597_v22  ;;  %v1575_v36 = vadd.f32 %v1574_v48, %v1573_v45 }
 0x39b   : > { %v1670_v52 = vmul.f32 %v1668_v4, %v1657_v38  ;;  %v1669_v21 = vmul.f32 %v1664_v23, %v1656_v15  ;;  %v1523_v17 = vadd.f32 %v1522_v1, %v1521_v50 }
 0x39c   : > { %v1648_v35 = vrot.slane %v1647_v7, 4  ;;  %v1624_v56 = vrot.slane %v1623_v11, 2  ;;  %v1600_v2 = vrot.slane %v1599_v51, 1 }
 0x39d   : > { %v1672_v39 = vsel %vm985_vm6, %v1670_v52, 0.0  ;;  %v1671_v40 = vsel %vm985_vm6, %v1669_v21, 0.0  ;;  %v1707_v8 = vsel %vm1706_vm9, %v1523_v17, %v1549_v12 }
 0x39e   : > { %v1649_v55 = vadd.f32 %v1648_v35, %v1647_v7  ;;  %v1673_v43 = vadd.f32 %v1672_v39, %v1671_v40  ;;  %v1694_v44 = vpop.permute.xlu0 %1693  ;;  %v1690_v26 = vpop.permute.xlu1 %1689  ;;  %v1625_v46 = vadd.f32 %v1624_v56, %v1623_v11  ;;  %v1601_v3 = vadd.f32 %v1600_v2, %v1599_v51 }
 0x39f   : > { %v1696_v33 = vmul.f32 %v1694_v44, %v1683_v37  ;;  %v1695_v47 = vmul.f32 %v1690_v26, %v1682_v41  ;;  %v1709_v13 = vsel %vm1708_vm10, %v1707_v8, %v1575_v36  ;;  %v1729_v11 = vmul.f32 %v2332_v32, %v2907_v57 }
 0x3a0   : > { %v1650_v53 = vrot.slane %v1649_v55, 2  ;;  %v1674_v54 = vrot.slane %v1673_v43, 4  ;;  %v1626_v38 = vrot.slane %v1625_v46, 1  ;;  %v1711_v24 = vsel %vm1710_vm11, %v1709_v13, %v1601_v3 }
 0x3a1   : > { %v1698_v58 = vsel %vm985_vm6, %v1696_v33, 0.0  ;;  %v1697_v60 = vsel %vm985_vm6, %v1695_v47, 0.0 }
 0x3a2   : > { %v1651_v62 = vadd.f32 %v1650_v53, %v1649_v55  ;;  %v1675_v0 = vadd.f32 %v1674_v54, %v1673_v43  ;;  %v1699_v49 = vadd.f32 %v1698_v58, %v1697_v60  ;;  %v1627_v59 = vadd.f32 %v1626_v38, %v1625_v46  ;;  %v1740_v23 = vpop.permute.xlu1 %1739 }
 0x3a4   : > { %v1676_v9 = vrot.slane %v1675_v0, 2  ;;  %v1700_v10 = vrot.slane %v1699_v49, 4  ;;  %v1652_v14 = vrot.slane %v1651_v62, 1  ;;  %v1713_v5 = vsel %vm1712_vm12, %v1711_v24, %v1627_v59 }
 0x3a6   : > { %v1677_v15 = vadd.f32 %v1676_v9, %v1675_v0  ;;  %v1701_v29 = vadd.f32 %v1700_v10, %v1699_v49  ;;  %v1653_v19 = vadd.f32 %v1652_v14, %v1651_v62 }
 0x3a8   : > { %v1678_v18 = vrot.slane %v1677_v15, 1  ;;  %v1702_v63 = vrot.slane %v1701_v29, 2  ;;  %v1715_v25 = vsel %vm1714_vm13, %v1713_v5, %v1653_v19 }
 0x3aa   : > { %v1703_v6 = vadd.f32 %v1702_v63, %v1701_v29  ;;  %v1679_v22 = vadd.f32 %v1678_v18, %v1677_v15 }
 0x3ac   : > { %v1704_v16 = vrot.slane %v1703_v6, 1  ;;  %v1717_v28 = vsel %vm1716_vm14, %v1715_v25, %v1679_v22 }
 0x3ae   : > { %v1705_v27 = vadd.f32 %v1704_v16, %v1703_v6 }
 0x3b0   : > { %v1719_v31 = vsel %vm1718_vm15, %v1717_v28, %v1705_v27 }
 0x3b1   : > { %1720 = vst.msk [vmem:[#allocation7] sm:$0xff] %vm985_vm6, %v1719_v31 }
 0x3b8   : > { %v1721_v7 = vld [vmem:[#allocation7] sm:$0xff] }
 0x3b9   : > { %v1730_v4 = vadd.f32 %v1729_v11, %v1721_v7 }
 0x3bb   : > { %v1742_v34 = vmul.f32 %v1740_v23, %v1730_v4 }
 0x3bd   : > { %v1743_v52 = vpack.c.bf16 %v1742_v34, %v1742_v34 }
 0x3bf   : > { %2441 = vmatmul.mubr.msk.bf16.vlgmr.msra.gmra.mxu1 %vm985_vm6, %v1743_v52 }
 0x47f   : > { %v1813_v21 = vpop.f32.mrf.mxu1 }
 0x480   : > { %v1819_v20 = vadd.f32 %v2585_v61, %v1813_v21 }
 0x481   : > { %v2442_v35 = vpop.f32.mrf.mxu1  ;;  %1824 = sbr.rel (%p2339_p8) target bundleno = 2105 (0x839), region = 108 }
 0x482   : > { %1820 = vst.msk [vmem:[#allocation2] sm:$0xff] %vm834_vm1, %v1819_v20 }
 0x483   : > { %v1816_v37 = vpop.f32.mrf.mxu1 }
 0x485   : > { %v2443_v56 = vpop.f32.mrf.mxu1 }
 0x486   : > { %v1825_v39 = vmul.f32 %v1819_v20, %v1819_v20  ;;  %v2342_v40 = vld [vmem:[%s3260_s28] ss:$0 sm:$0xff]  ;;  %v2638_v51 = vmov 0.0   ;;  %vm2639_vm0 = vmmov 0   ;;  %vm1870_vm2 = vcmask 7168   ;;  %v1961_v2 = vld [vmem:[%s3264_s21 + $0x38] sm:$0xff] }
 0x487   : > { %1867 = vrot.lane.b32.xlu1 %v2342_v40, %s2637_s1  ;;  %v2340_v44 = vld [vmem:[%s3261_s3] ss:$0 sm:$0xff]  ;;  %2444 = vmatprep.subr.mxu0 %v2638_v51  ;;  %vm1874_vm3 = vcmask 64512   ;;  %v1960_v9 = vld [vmem:[%s3264_s21 + $0x30] sm:$0xff]  ;;  %v1959_v10 = vld [vmem:[%s3264_s21 + $0x28] sm:$0xff] }
 0x488   : > { %v1826_v57 = vsel %vm834_vm1, %v1825_v39, 0.0  ;;  %v2341_v45 = vld [vmem:[%s3262_s16] ss:$0 sm:$0xff]  ;;  %2449 = vmatprep.subr.mxu1 %v2638_v51  ;;  %2446 = vmatprep.mubr.msk.f32.mxu0 %vm2639_vm0, %v2638_v51  ;;  %v1957_v12 = vld [vmem:[%s3264_s21 + $0x18] sm:$0xff]  ;;  %v1956_v14 = vld [vmem:[%s3264_s21 + $0x10] sm:$0xff] }
 0x489   : > { %1827 = vadd.xlane.f32.xlu0 %v1826_v57  ;;  %v1872_v53 = vld [vmem:[%s3263_s12] sm:$0xff]  ;;  %2465 = vmatprep.mubr.msk.f32.mxu1 %vm2639_vm0, %v2638_v51  ;;  %v1955_v15 = vld [vmem:[%s3264_s21 + $0x8] sm:$0xff]  ;;  %v2045_v13 = vld [vmem:[%s3266_s17 + $0x18] sm:$0xff] }
 0x48a   : > { %2445 = vmatpush3.msra.mxu0 %v1872_v53  ;;  %2450 = vmatpush3.msra.mxu1 %v1961_v2  ;;  %v1958_v38 = vld [vmem:[%s3264_s21 + $0x20] sm:$0xff]  ;;  %v2044_v22 = vld [vmem:[%s3266_s17 + $0x10] sm:$0xff]  ;;  %v2043_v24 = vld [vmem:[%s3266_s17 + $0x8] sm:$0xff] }
 0x48b   : > { %2468 = vmatprep.subr.mxu0 %v2638_v51  ;;  %2451 = vmatprep.subr.mxu1 %v2638_v51  ;;  %v1954_v29 = vld [vmem:[%s3264_s21] sm:$0xff]  ;;  %v2046_v23 = vld [vmem:[#allocation8] sm:$0x1] }
 0x48c   : > { %2452 = vmatpush3.msra.mxu1 %v1960_v9  ;;  %v1873_v36 = vld [vmem:[%s3265_s18] sm:$0x1] }
 0x48d   : > { %2453 = vmatprep.subr.mxu1 %v2638_v51  ;;  %v2042_v16 = vld [vmem:[%s3266_s17] sm:$0xff] }
 0x48e   : > { %2454 = vmatpush3.msra.mxu1 %v1959_v10  ;;  %v1962_v5 = vld [vmem:[%s3267_s0] sm:$0x1] }
 0x48f   : > { %2455 = vmatprep.subr.mxu1 %v2638_v51 }
 0x490   : > { %2456 = vmatpush3.msra.mxu1 %v1958_v38 }
 0x491   : > { %2457 = vmatprep.subr.mxu1 %v2638_v51 }
 0x492   : > { %2458 = vmatpush3.msra.mxu1 %v1957_v12 }
 0x493   : > { %2459 = vmatprep.subr.mxu1 %v2638_v51 }
 0x494   : > { %2460 = vmatpush3.msra.mxu1 %v1956_v14 }
 0x495   : > { %2461 = vmatprep.subr.mxu1 %v2638_v51 }
 0x496   : > { %2462 = vmatpush3.msra.mxu1 %v1955_v15 }
 0x497   : > { %2463 = vmatprep.subr.mxu1 %v2638_v51 }
 0x498   : > { %2464 = vmatpush3.msra.mxu1 %v1954_v29 }
 0x4f9   : > { %v1868_v49 = vpop.permute.xlu1 %1867 }
 0x512   : > { %v1828_v41 = vpop.xlane.xlu0 %1827 }
 0x513   : > { %v1829_v42 = vmul.f32 0.03125, %v1828_v41 }
 0x515   : > { %v1830_v55 = vadd.f32 1e-05, %v1829_v42 }
 0x517   : > { %2586 = vrsqrt.f32 %v1830_v55 }
 0x524   : > { %v2587_v43 = vpop.eup %2586 }
 0x525   : > { %v1832_v26 = vmul.f32 %v2587_v43, %v1819_v20 }
 0x527   : > { %v1840_v33 = vmul.f32 %v2340_v44, %v1832_v26 }
 0x529   : > { %v1848_v47 = vmul.f32 %v2341_v45, %v1840_v33 }
 0x52b   : > { %v1849_v50 = vsel %vm834_vm1, %v1848_v47, 0.0 }
 0x52c   : > { %1850 = vadd.xlane.f32.xlu0 %v1849_v50 }
 0x5b5   : > { %v1851_v54 = vpop.xlane.xlu0 %1850 }
 0x5b6   : > { %v1854_v46 = vrot.slane %v1851_v54, 4 }
 0x5b8   : > { %v1855_v58 = vadd.f32 %v1854_v46, %v1851_v54 }
 0x5ba   : > { %v1856_v60 = vrot.slane %v1855_v58, 2 }
 0x5bc   : > { %v1857_v30 = vadd.f32 %v1856_v60, %v1855_v58 }
 0x5be   : > { %v1858_v62 = vrot.slane %v1857_v30, 1 }
 0x5c0   : > { %v1859_v0 = vadd.f32 %v1858_v62, %v1857_v30 }
 0x5c2   : > { %v1860_v48 = vmul.f32 0.003125, %v1859_v0 }
 0x5c4   : > { %v1871_v1 = vsel %vm1870_vm2, %v1860_v48, %v1868_v49 }
 0x5c5   : > { %2447 = vmatmul.mubr.msk.f32.vlgmr.msra.gmra.mxu0 %vm1874_vm3, %v1871_v1 }
 0x5c6   : > { %2476 = vmatprep.mubr.msk.f32.mxu0 %vm2639_vm0, %v2638_v51  ;;  %2469 = vmatpush3.msra.mxu0 %v2045_v13 }
 0x5c7   : > { %2470 = vmatprep.subr.mxu0 %v2638_v51 }
 0x5c8   : > { %2471 = vmatpush3.msra.mxu0 %v2044_v22 }
 0x5c9   : > { %2472 = vmatprep.subr.mxu0 %v2638_v51 }
 0x5ca   : > { %2473 = vmatpush3.msra.mxu0 %v2043_v24 }
 0x5cb   : > { %2474 = vmatprep.subr.mxu0 %v2638_v51 }
 0x5cc   : > { %2475 = vmatpush3.msra.mxu0 %v2042_v16 }
 0x685   : > { %v1944_v17 = vpop.f32.mrf.mxu0 }
 0x686   : > { %v1945_v3 = vadd.f32 %v1944_v17, %v1873_v36 }
 0x687   : > { %v2448_v18 = vpop.f32.mrf.mxu0 }
 0x688   : > { %v1949_v63 = vmin.f32 %v1945_v3, 0.0  ;;  %vm1948_vm4 = vcmp.gt.f32.partialorder %v1945_v3, 0.0 }
 0x68a   : > { %v1950_v59 = vmul.f32 1.442695, %v1949_v63 }
 0x68c   : > { %2588 = vpow2.f32 %v1950_v59 }
 0x699   : > { %v2589_v8 = vpop.eup %2588 }
 0x69a   : > { %v2344_v19 = vadd.f32 -1.0, %v2589_v8 }
 0x69c   : > { %v1953_v6 = vsel %vm1948_vm4, %v1945_v3, %v2344_v19 }
 0x69d   : > { %2466 = vmatmul.mubr.msk.f32.vlgmr.msra.gmra.mxu1 %vm985_vm6, %v1953_v6  ;;  %vm2120_vm6 = vcmask 0  }
 0x75d   : > { %v2032_v25 = vpop.f32.mrf.mxu1 }
 0x75e   : > { %v2033_v27 = vadd.f32 %v2032_v25, %v1962_v5 }
 0x75f   : > { %v2467_v28 = vpop.f32.mrf.mxu1 }
 0x760   : > { %v2037_v31 = vmin.f32 %v2033_v27, 0.0  ;;  %vm2036_vm5 = vcmp.gt.f32.partialorder %v2033_v27, 0.0 }
 0x762   : > { %v2038_v32 = vmul.f32 1.442695, %v2037_v31 }
 0x764   : > { %2590 = vpow2.f32 %v2038_v32 }
 0x771   : > { %v2591_v11 = vpop.eup %2590 }
 0x772   : > { %v2346_v7 = vadd.f32 -1.0, %v2591_v11 }
 0x774   : > { %v2041_v4 = vsel %vm2036_vm5, %v2033_v27, %v2346_v7 }
 0x775   : > { %2477 = vmatmul.mubr.msk.f32.vlgmr.msra.gmra.mxu0 %vm834_vm1, %v2041_v4 }
 0x835   : > { %v2116_v34 = vpop.f32.mrf.mxu0 }
 0x836   : > { %v2117_v52 = vadd.f32 %v2116_v34, %v2046_v23 }
 0x837   : > { %v2478_v21 = vpop.f32.mrf.mxu0 }
 0x838   : > { %2121 = vst.msk [vmem:[%s823_s2] sm:$0x1] %vm2120_vm6, %v2117_v52 }
 0x839 PF: > { %s3268_s19 = sld [smem:[#allocation12_spill]] }
 0x83a   : > { %s3269_s23 = sld [smem:[#allocation10_spill]] }
 0x83b   : > { %s3270_s24 = sld [smem:[#allocation11_spill]] }
 0x83c   : > { %s3271_s2 = sld [smem:[#allocation13_spill]] }
 0x83d   : > { %s3272_s25 = sld [smem:[#allocation14_spill]] }
 0x83f   : > { %s32_s3 = sadd.s32 1, %s3268_s19  }
 0x840   : > { %p29_p9 = scmp.ge.s32.totalorder %s32_s3, 6  }
 0x842   :  { %31 = sbr.rel (!%p29_p9) target bundleno = 14 (0xe), region = 171 }

</bundles_post_ra>
